<compile_context>
chip_gen: v5e
topology: v5e:2x2
jax: 0.10.0
libtpu: 0.0.40
codegen_flags: <defaults>
</compile_context>

<pallas_src>
import functools

import numpy as np
import jax
import jax.numpy as jnp
from jax import lax
from jax.experimental import pallas as pl
from jax.experimental.pallas import tpu as pltpu

NEG = -1e30      # finite stand-in for -inf (keeps MXU / exp paths NaN-free)
BLOCK_B = 8      # samples packed into the sublane dimension per grid step


def _round_up(x, m):
    return (x + m - 1) // m * m


def _ctc_kernel(blank_logprob, in_lens_ref, out_lens_ref, attn_ref, onehot_ref,
                out_ref, e_ref):
    BB, t_max, k_max = attn_ref.shape          # block of BB samples
    s_pad = onehot_ref.shape[1]                # padded extended-state count (>= 2K+3)
    base = pl.program_id(0) * BB

    # ---------------- hoisted, loop-invariant constants ----------------
    lane_k = lax.broadcasted_iota(jnp.int32, (t_max, k_max), 1)
    even_s = (lax.broadcasted_iota(jnp.int32, (t_max, s_pad), 1) & 1) == 0
    s_idx = lax.broadcasted_iota(jnp.int32, (BB, s_pad), 1)
    row_idx = lax.broadcasted_iota(jnp.int32, (BB, s_pad), 0)
    neg_full = jnp.full((BB, s_pad), NEG, jnp.float32)

    # ------- per-sample log-softmax + emission gather (one-off, pre-loop) -------
    # e_ref rows are b-major: row b*t_max + t holds E[b, t, :] over extended states.
    S_mat = jnp.zeros((BB, s_pad), jnp.int32)   # per-row 2K+1
    T_mat = jnp.zeros((BB, s_pad), jnp.int32)   # per-row mel length
    t_hi = jnp.int32(1)
    for b in range(BB):                         # static unroll over the sublane batch
        K_b = in_lens_ref[base + b]             # text length (scalar, SMEM)
        T_b = out_lens_ref[base + b]            # mel length  (scalar, SMEM)
        t_hi = jnp.maximum(t_hi, T_b)
        S_mat = jnp.where(row_idx == b, 2 * K_b + 1, S_mat)
        T_mat = jnp.where(row_idx == b, T_b, T_mat)

        x_b = attn_ref[b]                                       # (t_max, k_max)
        # masked log-softmax over classes {blank} U {1..K}; blank is a constant.
        masked = jnp.where(lane_k < K_b, x_b, -jnp.inf)
        m = jnp.maximum(jnp.max(masked, axis=-1, keepdims=True), blank_logprob)
        z = jnp.sum(jnp.exp(masked - m), axis=-1, keepdims=True) \
            + jnp.exp(blank_logprob - m)
        logz = m + jnp.log(z)
        lp_b = jnp.maximum(masked - logz, NEG)                   # (t_max, k_max)
        # odd extended states pick their text class via one MXU matmul
        e_b = jnp.dot(lp_b, onehot_ref[...], preferred_element_type=jnp.float32)
        # even extended states are the (constant-logit) blank
        e_b = jnp.where(even_s, blank_logprob - logz, e_b)
        e_ref[pl.ds(b * t_max, t_max), :] = e_b

    t_hi = jnp.minimum(t_hi, t_max)             # dynamic trip count for the block

    # ---------------- hoisted recursion masks ----------------
    # skip transition (s-2 -> s) only for odd (non-blank) states s >= 3; labels
    # 1..K are all distinct so no label-equality check is needed.
    mask_skip = (s_idx >= 3) & ((s_idx & 1) == 1)
    valid_state = s_idx < S_mat                 # invalid lanes stay pinned at NEG
    final_mask = valid_state & (s_idx >= S_mat - 2)

    # alpha_0: only states 0 and 1 are reachable at t = 0.
    e0 = e_ref[pl.ds(0, BB, stride=t_max), :]        # (BB, s_pad) strided gather
    alpha0 = jnp.where((s_idx <= 1) & valid_state, e0, neg_full)

    # ---------------- CTC alpha recursion (log domain, 8 rows at once) ----------------
    def body(t, alpha):
        e_t = e_ref[pl.ds(t, BB, stride=t_max), :]   # off the alpha critical path
        upd = valid_state & (t < T_mat)              # off the alpha critical path
        # shift-by-1: lane 0 wraps in alpha[s_pad-1], which is an invalid state
        # (s_pad >= 2*k_max+3) and therefore always NEG -> no select needed.
        a1 = pltpu.roll(alpha, shift=1, axis=1)
        # shift-by-2: must still exclude blank (even) states and s < 3.
        a2 = jnp.where(mask_skip, pltpu.roll(alpha, shift=2, axis=1), neg_full)
        m = jnp.maximum(jnp.maximum(alpha, a1), a2)
        lse = m + jnp.log(jnp.exp(alpha - m) + jnp.exp(a1 - m) + jnp.exp(a2 - m))
        # single fused select: invalid states and rows past their T keep alpha.
        return jnp.where(upd, jnp.maximum(lse + e_t, NEG), alpha)

    alpha = lax.fori_loop(1, t_hi, body, alpha0)

    # loss = -logsumexp(alpha[S-1], alpha[S-2]) per row
    fin = jnp.where(final_mask, alpha, neg_full)
    fmax = jnp.max(fin, axis=-1, keepdims=True)
    log_p = fmax + jnp.log(jnp.sum(jnp.exp(fin - fmax), axis=-1, keepdims=True))
    out_ref[...] = -log_p                                # (BB, 1)


def attention_ctc_loss(attn_logprob, in_lens, out_lens, blank_logprob=-1.0):
    """attn_logprob: (B, 1, T_out_max, T_in_max) float; in_lens/out_lens: (B,) ints."""
    B = attn_logprob.shape[0]
    t_in = attn_logprob.shape[2]
    k_max = attn_logprob.shape[3]

    attn = attn_logprob[:, 0, :, :].astype(jnp.float32)        # (B, t_in, k_max)

    # pad time to a multiple of 8 (sublane tile) and batch to a multiple of BLOCK_B;
    # padded frames / rows are never used (length guards + slicing of the result).
    t_max = _round_up(t_in, 8)
    b_pad = _round_up(max(B, 1), BLOCK_B) - B
    if t_max != t_in or b_pad:
        attn = jnp.pad(attn, ((0, b_pad), (0, t_max - t_in), (0, 0)))
    in_l = jnp.asarray(in_lens, jnp.int32)
    out_l = jnp.asarray(out_lens, jnp.int32)
    if b_pad:
        in_l = jnp.concatenate([in_l, jnp.ones((b_pad,), jnp.int32)])
        out_l = jnp.concatenate([out_l, jnp.ones((b_pad,), jnp.int32)])
    B_pad = B + b_pad

    # one-hot map: text class j (lane j of attn) -> odd extended state 2j+1.
    # Pad states to >= 2*k_max+3 so the top >=2 lanes are always-invalid NEG
    # guard lanes (lets the kernel drop the post-roll select on the shift-1 path).
    s_pad = _round_up(2 * k_max + 3, 128)                      # lane-dense states
    s = np.arange(s_pad)
    j = np.arange(k_max)
    onehot = ((s[None, :] % 2 == 1) & ((s[None, :] - 1) // 2 == j[:, None]))
    onehot = jnp.asarray(onehot.astype(np.float32))            # (k_max, s_pad)

    grid_spec = pltpu.PrefetchScalarGridSpec(
        num_scalar_prefetch=2,
        grid=(B_pad // BLOCK_B,),
        in_specs=[
            pl.BlockSpec((BLOCK_B, t_max, k_max), lambda g, il, ol: (g, 0, 0)),
            pl.BlockSpec((k_max, s_pad), lambda g, il, ol: (0, 0)),
        ],
        out_specs=pl.BlockSpec((BLOCK_B, 1), lambda g, il, ol: (g, 0)),
        scratch_shapes=[pltpu.VMEM((BLOCK_B * t_max, s_pad), jnp.float32)],
    )

    # VMEM budget: emission scratch + double-buffered attn block + onehot + headroom.
    # TODO(synk): for very long mel sequences on v7x (64 MiB VMEM), compute the
    # emission scratch in t-chunks instead of one (BLOCK_B*t_max, s_pad) buffer.
    vmem_need = 4 * (BLOCK_B * t_max * s_pad
                     + 2 * BLOCK_B * t_max * k_max
                     + 2 * k_max * s_pad) + (4 << 20)
    vmem_limit = int(min(max(vmem_need, 32 << 20), 64 << 20))

    losses = pl.pallas_call(
        functools.partial(_ctc_kernel, float(blank_logprob)),
        out_shape=jax.ShapeDtypeStruct((B_pad, 1), jnp.float32),
        grid_spec=grid_spec,
        compiler_params=pltpu.CompilerParams(
            dimension_semantics=("parallel",),
            vmem_limit_bytes=vmem_limit),
    )(in_l, out_l, attn, onehot)

    losses = losses[:B, 0]
    # torch.nn.CTCLoss(reduction='mean', zero_infinity=True), one sample per call:
    # infinite loss (only possible when T < K here) -> 0, else divide by target length K.
    feasible = jnp.asarray(out_lens) >= jnp.asarray(in_lens)
    per_sample = jnp.where(feasible, losses / jnp.asarray(in_lens, jnp.float32), 0.0)
    return jnp.sum(per_sample) / B


# ------------------------- pure-numpy reference -------------------------
def _np_lse(v):
    v = np.asarray(v, dtype=np.float64)
    m = np.max(v)
    if not np.isfinite(m):
        return m
    return m + np.log(np.sum(np.exp(v - m)))


def ref_attention_ctc_loss(attn_logprob, in_lens, out_lens, blank_logprob=-1.0):
    attn = np.asarray(attn_logprob, dtype=np.float64)
    B = attn.shape[0]
    total = 0.0
    for b in range(B):
        K = int(in_lens[b]); T = int(out_lens[b])
        x = attn[b, 0, :T, :K]
        x = np.concatenate([np.full((T, 1), blank_logprob, np.float64), x], axis=1)
        m = x.max(axis=-1, keepdims=True)
        lp = x - (m + np.log(np.exp(x - m).sum(-1, keepdims=True)))
        S = 2 * K + 1
        labels = [0 if s % 2 == 0 else (s + 1) // 2 for s in range(S)]
        alpha = np.full(S, -np.inf)
        alpha[0] = lp[0, labels[0]]
        if S > 1:
            alpha[1] = lp[0, labels[1]]
        for t in range(1, T):
            new = np.full(S, -np.inf)
            for s_ in range(S):
                cands = [alpha[s_]]
                if s_ >= 1:
                    cands.append(alpha[s_ - 1])
                if s_ >= 2 and labels[s_] != 0 and labels[s_] != labels[s_ - 2]:
                    cands.append(alpha[s_ - 2])
                new[s_] = _np_lse(cands) + lp[t, labels[s_]]
            alpha = new
        ll = _np_lse([alpha[S - 1], alpha[S - 2]]) if S >= 2 else alpha[S - 1]
        loss = -ll
        loss = 0.0 if not np.isfinite(loss) else loss / K
        total += loss
    return total / B


if __name__ == "__main__":
    key = jax.random.PRNGKey(0)
    B, t_max, k_max = 2, 16, 8
    attn_logprob = jax.random.normal(key, (B, 1, t_max, k_max), dtype=jnp.float32)
    in_lens = jnp.array([8, 5], dtype=jnp.int32)     # text lengths
    out_lens = jnp.array([16, 11], dtype=jnp.int32)  # mel lengths

    cost = attention_ctc_loss(attn_logprob, in_lens, out_lens)
    cost = jax.block_until_ready(cost)

    ref = ref_attention_ctc_loss(np.asarray(attn_logprob), np.asarray(in_lens),
                                 np.asarray(out_lens))
    assert abs(float(cost) - float(ref)) < 5e-3, (float(cost), float(ref))
    print("KERNEL_OK")
</pallas_src>

<mosaic_0001>
module attributes {stable_mosaic.version = 11 : i64} {
  func.func @_ctc_kernel(%arg0: i32, %arg1: memref<8xi32, #tpu.memory_space<smem>>, %arg2: memref<8xi32, #tpu.memory_space<smem>>, %arg3: memref<8x16x8xf32, #tpu.memory_space<vmem>>, %arg4: memref<8x128xf32, #tpu.memory_space<vmem>>, %arg5: memref<8x1xf32, #tpu.memory_space<vmem>>, %arg6: memref<128x128xf32, #tpu.memory_space<vmem>>) attributes {dimension_semantics = [#tpu.dimension_semantics<parallel>], iteration_bounds = array<i64: 1>, scalar_prefetch = 2 : i64, scratch_operands = 1 : i64, tpu.core_type = #tpu.core_type<tc>, window_params = [{transform_indices = @transform_0, window_bounds = array<i64: 8, 16, 8>}, {pipeline_mode = #tpu.pipeline_mode<synchronous>, transform_indices = @transform_1, window_bounds = array<i64: 8, 128>}, {transform_indices = @transform_2, window_bounds = array<i64: 8, 1>}]} {
    %c8_i32 = arith.constant 8 : i32
    %0 = arith.muli %arg0, %c8_i32 : i32
    %1 = tpu.iota {dimensions = array<i32: 1>} : vector<16x8xi32>
    %2 = tpu.iota {dimensions = array<i32: 1>} : vector<16x128xi32>
    %c1_i32 = arith.constant 1 : i32
    %3 = vector.broadcast %c1_i32 : i32 to vector<16x128xi32>
    %4 = arith.andi %2, %3 : vector<16x128xi32>
    %c0_i32 = arith.constant 0 : i32
    %5 = vector.broadcast %c0_i32 : i32 to vector<16x128xi32>
    %6 = arith.cmpi eq, %4, %5 : vector<16x128xi32>
    %7 = tpu.iota {dimensions = array<i32: 1>} : vector<8x128xi32>
    %8 = tpu.iota {dimensions = array<i32: 0>} : vector<8x128xi32>
    %cst = arith.constant -1.000000e+30 : f32
    %9 = vector.broadcast %cst : f32 to vector<8x128xf32>
    %c0_i32_0 = arith.constant 0 : i32
    %10 = vector.broadcast %c0_i32_0 : i32 to vector<8x128xi32>
    %c0_i32_1 = arith.constant 0 : i32
    %11 = vector.broadcast %c0_i32_1 : i32 to vector<8x128xi32>
    %c0_i32_2 = arith.constant 0 : i32
    %12 = arith.addi %0, %c0_i32_2 : i32
    %13 = arith.index_cast %12 : i32 to index
    %14 = memref.load %arg1[%13] : memref<8xi32, #tpu.memory_space<smem>>
    %c0_i32_3 = arith.constant 0 : i32
    %15 = arith.addi %0, %c0_i32_3 : i32
    %16 = arith.index_cast %15 : i32 to index
    %17 = memref.load %arg2[%16] : memref<8xi32, #tpu.memory_space<smem>>
    %c1_i32_4 = arith.constant 1 : i32
    %18 = arith.maxsi %c1_i32_4, %17 : i32
    %c0_i32_5 = arith.constant 0 : i32
    %19 = vector.broadcast %c0_i32_5 : i32 to vector<8x128xi32>
    %20 = arith.cmpi eq, %8, %19 : vector<8x128xi32>
    %c2_i32 = arith.constant 2 : i32
    %21 = arith.muli %c2_i32, %14 : i32
    %c1_i32_6 = arith.constant 1 : i32
    %22 = arith.addi %21, %c1_i32_6 : i32
    %23 = vector.broadcast %22 : i32 to vector<8x128xi32>
    %24 = arith.select %20, %23, %10 : vector<8x128xi1>, vector<8x128xi32>
    %c0_i32_7 = arith.constant 0 : i32
    %25 = vector.broadcast %c0_i32_7 : i32 to vector<8x128xi32>
    %26 = arith.cmpi eq, %8, %25 : vector<8x128xi32>
    %27 = vector.broadcast %17 : i32 to vector<8x128xi32>
    %28 = arith.select %26, %27, %11 : vector<8x128xi1>, vector<8x128xi32>
    %c0 = arith.constant 0 : index
    %c0_8 = arith.constant 0 : index
    %c0_9 = arith.constant 0 : index
    %29 = vector.load %arg3[%c0, %c0_8, %c0_9] : memref<8x16x8xf32, #tpu.memory_space<vmem>>, vector<1x16x8xf32>
    %30 = vector.shape_cast %29 : vector<1x16x8xf32> to vector<16x8xf32>
    %31 = vector.broadcast %14 : i32 to vector<16x8xi32>
    %32 = arith.cmpi slt, %1, %31 : vector<16x8xi32>
    %cst_10 = arith.constant 0xFF800000 : f32
    %33 = vector.broadcast %cst_10 : f32 to vector<16x8xf32>
    %34 = arith.select %32, %30, %33 : vector<16x8xi1>, vector<16x8xf32>
    %cst_11 = arith.constant dense<0xFF800000> : vector<16xf32>
    %35 = vector.multi_reduction <maximumf>, %34, %cst_11 [1] : vector<16x8xf32> to vector<16xf32>
    %36 = vector.shape_cast %35 : vector<16xf32> to vector<16x1xf32>
    %cst_12 = arith.constant -1.000000e+00 : f32
    %37 = vector.broadcast %cst_12 : f32 to vector<16x1xf32>
    %38 = arith.maximumf %36, %37 : vector<16x1xf32>
    %39 = vector.broadcast %38 : vector<16x1xf32> to vector<16x8xf32>
    %40 = arith.subf %34, %39 : vector<16x8xf32>
    %41 = math.exp %40 : vector<16x8xf32>
    %cst_13 = arith.constant dense<0.000000e+00> : vector<16xf32>
    %42 = vector.multi_reduction <add>, %41, %cst_13 [1] : vector<16x8xf32> to vector<16xf32>
    %43 = vector.shape_cast %42 : vector<16xf32> to vector<16x1xf32>
    %cst_14 = arith.constant -1.000000e+00 : f32
    %44 = vector.broadcast %cst_14 : f32 to vector<16x1xf32>
    %45 = arith.subf %44, %38 : vector<16x1xf32>
    %46 = math.exp %45 : vector<16x1xf32>
    %47 = arith.addf %43, %46 : vector<16x1xf32>
    %48 = math.log %47 : vector<16x1xf32>
    %49 = arith.addf %38, %48 : vector<16x1xf32>
    %50 = vector.broadcast %49 : vector<16x1xf32> to vector<16x8xf32>
    %51 = arith.subf %34, %50 : vector<16x8xf32>
    %cst_15 = arith.constant -1.000000e+30 : f32
    %52 = vector.broadcast %cst_15 : f32 to vector<16x8xf32>
    %53 = arith.maximumf %51, %52 : vector<16x8xf32>
    %c0_16 = arith.constant 0 : index
    %c0_17 = arith.constant 0 : index
    %54 = vector.load %arg4[%c0_16, %c0_17] : memref<8x128xf32, #tpu.memory_space<vmem>>, vector<8x128xf32>
    %cst_18 = arith.constant dense<0.000000e+00> : vector<16x128xf32>
    %55 = tpu.matmul %53, %54, %cst_18 {dimension_numbers = #tpu.dot_dimension_numbers<[1], [0], [0], [1], [0, 0, 1, 1], [], []>} : vector<16x8xf32>, vector<8x128xf32>, vector<16x128xf32> -> vector<16x128xf32>
    %cst_19 = arith.constant -1.000000e+00 : f32
    %56 = vector.broadcast %cst_19 : f32 to vector<16x1xf32>
    %57 = arith.subf %56, %49 : vector<16x1xf32>
    %58 = vector.shape_cast %57 : vector<16x1xf32> to vector<16x1xf32>
    %59 = vector.broadcast %58 : vector<16x1xf32> to vector<16x128xf32>
    %60 = arith.select %6, %59, %55 : vector<16x128xi1>, vector<16x128xf32>
    %c0_20 = arith.constant 0 : index
    %c0_21 = arith.constant 0 : index
    %61 = vector.load %arg6[%c0_20, %c0_21] : memref<128x128xf32, #tpu.memory_space<vmem>>, vector<16x128xf32>
    tpu.vector_store %arg6[%c0_20, %c0_21], %60 {strides = array<i32>} : memref<128x128xf32, #tpu.memory_space<vmem>>, vector<16x128xf32>,
    %c1_i32_22 = arith.constant 1 : i32
    %62 = arith.addi %0, %c1_i32_22 : i32
    %63 = arith.index_cast %62 : i32 to index
    %64 = memref.load %arg1[%63] : memref<8xi32, #tpu.memory_space<smem>>
    %c1_i32_23 = arith.constant 1 : i32
    %65 = arith.addi %0, %c1_i32_23 : i32
    %66 = arith.index_cast %65 : i32 to index
    %67 = memref.load %arg2[%66] : memref<8xi32, #tpu.memory_space<smem>>
    %68 = arith.maxsi %18, %67 : i32
    %c1_i32_24 = arith.constant 1 : i32
    %69 = vector.broadcast %c1_i32_24 : i32 to vector<8x128xi32>
    %70 = arith.cmpi eq, %8, %69 : vector<8x128xi32>
    %c2_i32_25 = arith.constant 2 : i32
    %71 = arith.muli %c2_i32_25, %64 : i32
    %c1_i32_26 = arith.constant 1 : i32
    %72 = arith.addi %71, %c1_i32_26 : i32
    %73 = vector.broadcast %72 : i32 to vector<8x128xi32>
    %74 = arith.select %70, %73, %24 : vector<8x128xi1>, vector<8x128xi32>
    %c1_i32_27 = arith.constant 1 : i32
    %75 = vector.broadcast %c1_i32_27 : i32 to vector<8x128xi32>
    %76 = arith.cmpi eq, %8, %75 : vector<8x128xi32>
    %77 = vector.broadcast %67 : i32 to vector<8x128xi32>
    %78 = arith.select %76, %77, %28 : vector<8x128xi1>, vector<8x128xi32>
    %c1 = arith.constant 1 : index
    %c0_28 = arith.constant 0 : index
    %c0_29 = arith.constant 0 : index
    %79 = vector.load %arg3[%c1, %c0_28, %c0_29] : memref<8x16x8xf32, #tpu.memory_space<vmem>>, vector<1x16x8xf32>
    %80 = vector.shape_cast %79 : vector<1x16x8xf32> to vector<16x8xf32>
    %81 = vector.broadcast %64 : i32 to vector<16x8xi32>
    %82 = arith.cmpi slt, %1, %81 : vector<16x8xi32>
    %cst_30 = arith.constant 0xFF800000 : f32
    %83 = vector.broadcast %cst_30 : f32 to vector<16x8xf32>
    %84 = arith.select %82, %80, %83 : vector<16x8xi1>, vector<16x8xf32>
    %cst_31 = arith.constant dense<0xFF800000> : vector<16xf32>
    %85 = vector.multi_reduction <maximumf>, %84, %cst_31 [1] : vector<16x8xf32> to vector<16xf32>
    %86 = vector.shape_cast %85 : vector<16xf32> to vector<16x1xf32>
    %cst_32 = arith.constant -1.000000e+00 : f32
    %87 = vector.broadcast %cst_32 : f32 to vector<16x1xf32>
    %88 = arith.maximumf %86, %87 : vector<16x1xf32>
    %89 = vector.broadcast %88 : vector<16x1xf32> to vector<16x8xf32>
    %90 = arith.subf %84, %89 : vector<16x8xf32>
    %91 = math.exp %90 : vector<16x8xf32>
    %cst_33 = arith.constant dense<0.000000e+00> : vector<16xf32>
    %92 = vector.multi_reduction <add>, %91, %cst_33 [1] : vector<16x8xf32> to vector<16xf32>
    %93 = vector.shape_cast %92 : vector<16xf32> to vector<16x1xf32>
    %cst_34 = arith.constant -1.000000e+00 : f32
    %94 = vector.broadcast %cst_34 : f32 to vector<16x1xf32>
    %95 = arith.subf %94, %88 : vector<16x1xf32>
    %96 = math.exp %95 : vector<16x1xf32>
    %97 = arith.addf %93, %96 : vector<16x1xf32>
    %98 = math.log %97 : vector<16x1xf32>
    %99 = arith.addf %88, %98 : vector<16x1xf32>
    %100 = vector.broadcast %99 : vector<16x1xf32> to vector<16x8xf32>
    %101 = arith.subf %84, %100 : vector<16x8xf32>
    %cst_35 = arith.constant -1.000000e+30 : f32
    %102 = vector.broadcast %cst_35 : f32 to vector<16x8xf32>
    %103 = arith.maximumf %101, %102 : vector<16x8xf32>
    %c0_36 = arith.constant 0 : index
    %c0_37 = arith.constant 0 : index
    %104 = vector.load %arg4[%c0_36, %c0_37] : memref<8x128xf32, #tpu.memory_space<vmem>>, vector<8x128xf32>
    %cst_38 = arith.constant dense<0.000000e+00> : vector<16x128xf32>
    %105 = tpu.matmul %103, %104, %cst_38 {dimension_numbers = #tpu.dot_dimension_numbers<[1], [0], [0], [1], [0, 0, 1, 1], [], []>} : vector<16x8xf32>, vector<8x128xf32>, vector<16x128xf32> -> vector<16x128xf32>
    %cst_39 = arith.constant -1.000000e+00 : f32
    %106 = vector.broadcast %cst_39 : f32 to vector<16x1xf32>
    %107 = arith.subf %106, %99 : vector<16x1xf32>
    %108 = vector.shape_cast %107 : vector<16x1xf32> to vector<16x1xf32>
    %109 = vector.broadcast %108 : vector<16x1xf32> to vector<16x128xf32>
    %110 = arith.select %6, %109, %105 : vector<16x128xi1>, vector<16x128xf32>
    %c16 = arith.constant 16 : index
    %c0_40 = arith.constant 0 : index
    %111 = vector.load %arg6[%c16, %c0_40] : memref<128x128xf32, #tpu.memory_space<vmem>>, vector<16x128xf32>
    tpu.vector_store %arg6[%c16, %c0_40], %110 {strides = array<i32>} : memref<128x128xf32, #tpu.memory_space<vmem>>, vector<16x128xf32>,
    %c2_i32_41 = arith.constant 2 : i32
    %112 = arith.addi %0, %c2_i32_41 : i32
    %113 = arith.index_cast %112 : i32 to index
    %114 = memref.load %arg1[%113] : memref<8xi32, #tpu.memory_space<smem>>
    %c2_i32_42 = arith.constant 2 : i32
    %115 = arith.addi %0, %c2_i32_42 : i32
    %116 = arith.index_cast %115 : i32 to index
    %117 = memref.load %arg2[%116] : memref<8xi32, #tpu.memory_space<smem>>
    %118 = arith.maxsi %68, %117 : i32
    %c2_i32_43 = arith.constant 2 : i32
    %119 = vector.broadcast %c2_i32_43 : i32 to vector<8x128xi32>
    %120 = arith.cmpi eq, %8, %119 : vector<8x128xi32>
    %c2_i32_44 = arith.constant 2 : i32
    %121 = arith.muli %c2_i32_44, %114 : i32
    %c1_i32_45 = arith.constant 1 : i32
    %122 = arith.addi %121, %c1_i32_45 : i32
    %123 = vector.broadcast %122 : i32 to vector<8x128xi32>
    %124 = arith.select %120, %123, %74 : vector<8x128xi1>, vector<8x128xi32>
    %c2_i32_46 = arith.constant 2 : i32
    %125 = vector.broadcast %c2_i32_46 : i32 to vector<8x128xi32>
    %126 = arith.cmpi eq, %8, %125 : vector<8x128xi32>
    %127 = vector.broadcast %117 : i32 to vector<8x128xi32>
    %128 = arith.select %126, %127, %78 : vector<8x128xi1>, vector<8x128xi32>
    %c2 = arith.constant 2 : index
    %c0_47 = arith.constant 0 : index
    %c0_48 = arith.constant 0 : index
    %129 = vector.load %arg3[%c2, %c0_47, %c0_48] : memref<8x16x8xf32, #tpu.memory_space<vmem>>, vector<1x16x8xf32>
    %130 = vector.shape_cast %129 : vector<1x16x8xf32> to vector<16x8xf32>
    %131 = vector.broadcast %114 : i32 to vector<16x8xi32>
    %132 = arith.cmpi slt, %1, %131 : vector<16x8xi32>
    %cst_49 = arith.constant 0xFF800000 : f32
    %133 = vector.broadcast %cst_49 : f32 to vector<16x8xf32>
    %134 = arith.select %132, %130, %133 : vector<16x8xi1>, vector<16x8xf32>
    %cst_50 = arith.constant dense<0xFF800000> : vector<16xf32>
    %135 = vector.multi_reduction <maximumf>, %134, %cst_50 [1] : vector<16x8xf32> to vector<16xf32>
    %136 = vector.shape_cast %135 : vector<16xf32> to vector<16x1xf32>
    %cst_51 = arith.constant -1.000000e+00 : f32
    %137 = vector.broadcast %cst_51 : f32 to vector<16x1xf32>
    %138 = arith.maximumf %136, %137 : vector<16x1xf32>
    %139 = vector.broadcast %138 : vector<16x1xf32> to vector<16x8xf32>
    %140 = arith.subf %134, %139 : vector<16x8xf32>
    %141 = math.exp %140 : vector<16x8xf32>
    %cst_52 = arith.constant dense<0.000000e+00> : vector<16xf32>
    %142 = vector.multi_reduction <add>, %141, %cst_52 [1] : vector<16x8xf32> to vector<16xf32>
    %143 = vector.shape_cast %142 : vector<16xf32> to vector<16x1xf32>
    %cst_53 = arith.constant -1.000000e+00 : f32
    %144 = vector.broadcast %cst_53 : f32 to vector<16x1xf32>
    %145 = arith.subf %144, %138 : vector<16x1xf32>
    %146 = math.exp %145 : vector<16x1xf32>
    %147 = arith.addf %143, %146 : vector<16x1xf32>
    %148 = math.log %147 : vector<16x1xf32>
    %149 = arith.addf %138, %148 : vector<16x1xf32>
    %150 = vector.broadcast %149 : vector<16x1xf32> to vector<16x8xf32>
    %151 = arith.subf %134, %150 : vector<16x8xf32>
    %cst_54 = arith.constant -1.000000e+30 : f32
    %152 = vector.broadcast %cst_54 : f32 to vector<16x8xf32>
    %153 = arith.maximumf %151, %152 : vector<16x8xf32>
    %c0_55 = arith.constant 0 : index
    %c0_56 = arith.constant 0 : index
    %154 = vector.load %arg4[%c0_55, %c0_56] : memref<8x128xf32, #tpu.memory_space<vmem>>, vector<8x128xf32>
    %cst_57 = arith.constant dense<0.000000e+00> : vector<16x128xf32>
    %155 = tpu.matmul %153, %154, %cst_57 {dimension_numbers = #tpu.dot_dimension_numbers<[1], [0], [0], [1], [0, 0, 1, 1], [], []>} : vector<16x8xf32>, vector<8x128xf32>, vector<16x128xf32> -> vector<16x128xf32>
    %cst_58 = arith.constant -1.000000e+00 : f32
    %156 = vector.broadcast %cst_58 : f32 to vector<16x1xf32>
    %157 = arith.subf %156, %149 : vector<16x1xf32>
    %158 = vector.shape_cast %157 : vector<16x1xf32> to vector<16x1xf32>
    %159 = vector.broadcast %158 : vector<16x1xf32> to vector<16x128xf32>
    %160 = arith.select %6, %159, %155 : vector<16x128xi1>, vector<16x128xf32>
    %c32 = arith.constant 32 : index
    %c0_59 = arith.constant 0 : index
    %161 = vector.load %arg6[%c32, %c0_59] : memref<128x128xf32, #tpu.memory_space<vmem>>, vector<16x128xf32>
    tpu.vector_store %arg6[%c32, %c0_59], %160 {strides = array<i32>} : memref<128x128xf32, #tpu.memory_space<vmem>>, vector<16x128xf32>,
    %c3_i32 = arith.constant 3 : i32
    %162 = arith.addi %0, %c3_i32 : i32
    %163 = arith.index_cast %162 : i32 to index
    %164 = memref.load %arg1[%163] : memref<8xi32, #tpu.memory_space<smem>>
    %c3_i32_60 = arith.constant 3 : i32
    %165 = arith.addi %0, %c3_i32_60 : i32
    %166 = arith.index_cast %165 : i32 to index
    %167 = memref.load %arg2[%166] : memref<8xi32, #tpu.memory_space<smem>>
    %168 = arith.maxsi %118, %167 : i32
    %c3_i32_61 = arith.constant 3 : i32
    %169 = vector.broadcast %c3_i32_61 : i32 to vector<8x128xi32>
    %170 = arith.cmpi eq, %8, %169 : vector<8x128xi32>
    %c2_i32_62 = arith.constant 2 : i32
    %171 = arith.muli %c2_i32_62, %164 : i32
    %c1_i32_63 = arith.constant 1 : i32
    %172 = arith.addi %171, %c1_i32_63 : i32
    %173 = vector.broadcast %172 : i32 to vector<8x128xi32>
    %174 = arith.select %170, %173, %124 : vector<8x128xi1>, vector<8x128xi32>
    %c3_i32_64 = arith.constant 3 : i32
    %175 = vector.broadcast %c3_i32_64 : i32 to vector<8x128xi32>
    %176 = arith.cmpi eq, %8, %175 : vector<8x128xi32>
    %177 = vector.broadcast %167 : i32 to vector<8x128xi32>
    %178 = arith.select %176, %177, %128 : vector<8x128xi1>, vector<8x128xi32>
    %c3 = arith.constant 3 : index
    %c0_65 = arith.constant 0 : index
    %c0_66 = arith.constant 0 : index
    %179 = vector.load %arg3[%c3, %c0_65, %c0_66] : memref<8x16x8xf32, #tpu.memory_space<vmem>>, vector<1x16x8xf32>
    %180 = vector.shape_cast %179 : vector<1x16x8xf32> to vector<16x8xf32>
    %181 = vector.broadcast %164 : i32 to vector<16x8xi32>
    %182 = arith.cmpi slt, %1, %181 : vector<16x8xi32>
    %cst_67 = arith.constant 0xFF800000 : f32
    %183 = vector.broadcast %cst_67 : f32 to vector<16x8xf32>
    %184 = arith.select %182, %180, %183 : vector<16x8xi1>, vector<16x8xf32>
    %cst_68 = arith.constant dense<0xFF800000> : vector<16xf32>
    %185 = vector.multi_reduction <maximumf>, %184, %cst_68 [1] : vector<16x8xf32> to vector<16xf32>
    %186 = vector.shape_cast %185 : vector<16xf32> to vector<16x1xf32>
    %cst_69 = arith.constant -1.000000e+00 : f32
    %187 = vector.broadcast %cst_69 : f32 to vector<16x1xf32>
    %188 = arith.maximumf %186, %187 : vector<16x1xf32>
    %189 = vector.broadcast %188 : vector<16x1xf32> to vector<16x8xf32>
    %190 = arith.subf %184, %189 : vector<16x8xf32>
    %191 = math.exp %190 : vector<16x8xf32>
    %cst_70 = arith.constant dense<0.000000e+00> : vector<16xf32>
    %192 = vector.multi_reduction <add>, %191, %cst_70 [1] : vector<16x8xf32> to vector<16xf32>
    %193 = vector.shape_cast %192 : vector<16xf32> to vector<16x1xf32>
    %cst_71 = arith.constant -1.000000e+00 : f32
    %194 = vector.broadcast %cst_71 : f32 to vector<16x1xf32>
    %195 = arith.subf %194, %188 : vector<16x1xf32>
    %196 = math.exp %195 : vector<16x1xf32>
    %197 = arith.addf %193, %196 : vector<16x1xf32>
    %198 = math.log %197 : vector<16x1xf32>
    %199 = arith.addf %188, %198 : vector<16x1xf32>
    %200 = vector.broadcast %199 : vector<16x1xf32> to vector<16x8xf32>
    %201 = arith.subf %184, %200 : vector<16x8xf32>
    %cst_72 = arith.constant -1.000000e+30 : f32
    %202 = vector.broadcast %cst_72 : f32 to vector<16x8xf32>
    %203 = arith.maximumf %201, %202 : vector<16x8xf32>
    %c0_73 = arith.constant 0 : index
    %c0_74 = arith.constant 0 : index
    %204 = vector.load %arg4[%c0_73, %c0_74] : memref<8x128xf32, #tpu.memory_space<vmem>>, vector<8x128xf32>
    %cst_75 = arith.constant dense<0.000000e+00> : vector<16x128xf32>
    %205 = tpu.matmul %203, %204, %cst_75 {dimension_numbers = #tpu.dot_dimension_numbers<[1], [0], [0], [1], [0, 0, 1, 1], [], []>} : vector<16x8xf32>, vector<8x128xf32>, vector<16x128xf32> -> vector<16x128xf32>
    %cst_76 = arith.constant -1.000000e+00 : f32
    %206 = vector.broadcast %cst_76 : f32 to vector<16x1xf32>
    %207 = arith.subf %206, %199 : vector<16x1xf32>
    %208 = vector.shape_cast %207 : vector<16x1xf32> to vector<16x1xf32>
    %209 = vector.broadcast %208 : vector<16x1xf32> to vector<16x128xf32>
    %210 = arith.select %6, %209, %205 : vector<16x128xi1>, vector<16x128xf32>
    %c48 = arith.constant 48 : index
    %c0_77 = arith.constant 0 : index
    %211 = vector.load %arg6[%c48, %c0_77] : memref<128x128xf32, #tpu.memory_space<vmem>>, vector<16x128xf32>
    tpu.vector_store %arg6[%c48, %c0_77], %210 {strides = array<i32>} : memref<128x128xf32, #tpu.memory_space<vmem>>, vector<16x128xf32>,
    %c4_i32 = arith.constant 4 : i32
    %212 = arith.addi %0, %c4_i32 : i32
    %213 = arith.index_cast %212 : i32 to index
    %214 = memref.load %arg1[%213] : memref<8xi32, #tpu.memory_space<smem>>
    %c4_i32_78 = arith.constant 4 : i32
    %215 = arith.addi %0, %c4_i32_78 : i32
    %216 = arith.index_cast %215 : i32 to index
    %217 = memref.load %arg2[%216] : memref<8xi32, #tpu.memory_space<smem>>
    %218 = arith.maxsi %168, %217 : i32
    %c4_i32_79 = arith.constant 4 : i32
    %219 = vector.broadcast %c4_i32_79 : i32 to vector<8x128xi32>
    %220 = arith.cmpi eq, %8, %219 : vector<8x128xi32>
    %c2_i32_80 = arith.constant 2 : i32
    %221 = arith.muli %c2_i32_80, %214 : i32
    %c1_i32_81 = arith.constant 1 : i32
    %222 = arith.addi %221, %c1_i32_81 : i32
    %223 = vector.broadcast %222 : i32 to vector<8x128xi32>
    %224 = arith.select %220, %223, %174 : vector<8x128xi1>, vector<8x128xi32>
    %c4_i32_82 = arith.constant 4 : i32
    %225 = vector.broadcast %c4_i32_82 : i32 to vector<8x128xi32>
    %226 = arith.cmpi eq, %8, %225 : vector<8x128xi32>
    %227 = vector.broadcast %217 : i32 to vector<8x128xi32>
    %228 = arith.select %226, %227, %178 : vector<8x128xi1>, vector<8x128xi32>
    %c4 = arith.constant 4 : index
    %c0_83 = arith.constant 0 : index
    %c0_84 = arith.constant 0 : index
    %229 = vector.load %arg3[%c4, %c0_83, %c0_84] : memref<8x16x8xf32, #tpu.memory_space<vmem>>, vector<1x16x8xf32>
    %230 = vector.shape_cast %229 : vector<1x16x8xf32> to vector<16x8xf32>
    %231 = vector.broadcast %214 : i32 to vector<16x8xi32>
    %232 = arith.cmpi slt, %1, %231 : vector<16x8xi32>
    %cst_85 = arith.constant 0xFF800000 : f32
    %233 = vector.broadcast %cst_85 : f32 to vector<16x8xf32>
    %234 = arith.select %232, %230, %233 : vector<16x8xi1>, vector<16x8xf32>
    %cst_86 = arith.constant dense<0xFF800000> : vector<16xf32>
    %235 = vector.multi_reduction <maximumf>, %234, %cst_86 [1] : vector<16x8xf32> to vector<16xf32>
    %236 = vector.shape_cast %235 : vector<16xf32> to vector<16x1xf32>
    %cst_87 = arith.constant -1.000000e+00 : f32
    %237 = vector.broadcast %cst_87 : f32 to vector<16x1xf32>
    %238 = arith.maximumf %236, %237 : vector<16x1xf32>
    %239 = vector.broadcast %238 : vector<16x1xf32> to vector<16x8xf32>
    %240 = arith.subf %234, %239 : vector<16x8xf32>
    %241 = math.exp %240 : vector<16x8xf32>
    %cst_88 = arith.constant dense<0.000000e+00> : vector<16xf32>
    %242 = vector.multi_reduction <add>, %241, %cst_88 [1] : vector<16x8xf32> to vector<16xf32>
    %243 = vector.shape_cast %242 : vector<16xf32> to vector<16x1xf32>
    %cst_89 = arith.constant -1.000000e+00 : f32
    %244 = vector.broadcast %cst_89 : f32 to vector<16x1xf32>
    %245 = arith.subf %244, %238 : vector<16x1xf32>
    %246 = math.exp %245 : vector<16x1xf32>
    %247 = arith.addf %243, %246 : vector<16x1xf32>
    %248 = math.log %247 : vector<16x1xf32>
    %249 = arith.addf %238, %248 : vector<16x1xf32>
    %250 = vector.broadcast %249 : vector<16x1xf32> to vector<16x8xf32>
    %251 = arith.subf %234, %250 : vector<16x8xf32>
    %cst_90 = arith.constant -1.000000e+30 : f32
    %252 = vector.broadcast %cst_90 : f32 to vector<16x8xf32>
    %253 = arith.maximumf %251, %252 : vector<16x8xf32>
    %c0_91 = arith.constant 0 : index
    %c0_92 = arith.constant 0 : index
    %254 = vector.load %arg4[%c0_91, %c0_92] : memref<8x128xf32, #tpu.memory_space<vmem>>, vector<8x128xf32>
    %cst_93 = arith.constant dense<0.000000e+00> : vector<16x128xf32>
    %255 = tpu.matmul %253, %254, %cst_93 {dimension_numbers = #tpu.dot_dimension_numbers<[1], [0], [0], [1], [0, 0, 1, 1], [], []>} : vector<16x8xf32>, vector<8x128xf32>, vector<16x128xf32> -> vector<16x128xf32>
    %cst_94 = arith.constant -1.000000e+00 : f32
    %256 = vector.broadcast %cst_94 : f32 to vector<16x1xf32>
    %257 = arith.subf %256, %249 : vector<16x1xf32>
    %258 = vector.shape_cast %257 : vector<16x1xf32> to vector<16x1xf32>
    %259 = vector.broadcast %258 : vector<16x1xf32> to vector<16x128xf32>
    %260 = arith.select %6, %259, %255 : vector<16x128xi1>, vector<16x128xf32>
    %c64 = arith.constant 64 : index
    %c0_95 = arith.constant 0 : index
    %261 = vector.load %arg6[%c64, %c0_95] : memref<128x128xf32, #tpu.memory_space<vmem>>, vector<16x128xf32>
    tpu.vector_store %arg6[%c64, %c0_95], %260 {strides = array<i32>} : memref<128x128xf32, #tpu.memory_space<vmem>>, vector<16x128xf32>,
    %c5_i32 = arith.constant 5 : i32
    %262 = arith.addi %0, %c5_i32 : i32
    %263 = arith.index_cast %262 : i32 to index
    %264 = memref.load %arg1[%263] : memref<8xi32, #tpu.memory_space<smem>>
    %c5_i32_96 = arith.constant 5 : i32
    %265 = arith.addi %0, %c5_i32_96 : i32
    %266 = arith.index_cast %265 : i32 to index
    %267 = memref.load %arg2[%266] : memref<8xi32, #tpu.memory_space<smem>>
    %268 = arith.maxsi %218, %267 : i32
    %c5_i32_97 = arith.constant 5 : i32
    %269 = vector.broadcast %c5_i32_97 : i32 to vector<8x128xi32>
    %270 = arith.cmpi eq, %8, %269 : vector<8x128xi32>
    %c2_i32_98 = arith.constant 2 : i32
    %271 = arith.muli %c2_i32_98, %264 : i32
    %c1_i32_99 = arith.constant 1 : i32
    %272 = arith.addi %271, %c1_i32_99 : i32
    %273 = vector.broadcast %272 : i32 to vector<8x128xi32>
    %274 = arith.select %270, %273, %224 : vector<8x128xi1>, vector<8x128xi32>
    %c5_i32_100 = arith.constant 5 : i32
    %275 = vector.broadcast %c5_i32_100 : i32 to vector<8x128xi32>
    %276 = arith.cmpi eq, %8, %275 : vector<8x128xi32>
    %277 = vector.broadcast %267 : i32 to vector<8x128xi32>
    %278 = arith.select %276, %277, %228 : vector<8x128xi1>, vector<8x128xi32>
    %c5 = arith.constant 5 : index
    %c0_101 = arith.constant 0 : index
    %c0_102 = arith.constant 0 : index
    %279 = vector.load %arg3[%c5, %c0_101, %c0_102] : memref<8x16x8xf32, #tpu.memory_space<vmem>>, vector<1x16x8xf32>
    %280 = vector.shape_cast %279 : vector<1x16x8xf32> to vector<16x8xf32>
    %281 = vector.broadcast %264 : i32 to vector<16x8xi32>
    %282 = arith.cmpi slt, %1, %281 : vector<16x8xi32>
    %cst_103 = arith.constant 0xFF800000 : f32
    %283 = vector.broadcast %cst_103 : f32 to vector<16x8xf32>
    %284 = arith.select %282, %280, %283 : vector<16x8xi1>, vector<16x8xf32>
    %cst_104 = arith.constant dense<0xFF800000> : vector<16xf32>
    %285 = vector.multi_reduction <maximumf>, %284, %cst_104 [1] : vector<16x8xf32> to vector<16xf32>
    %286 = vector.shape_cast %285 : vector<16xf32> to vector<16x1xf32>
    %cst_105 = arith.constant -1.000000e+00 : f32
    %287 = vector.broadcast %cst_105 : f32 to vector<16x1xf32>
    %288 = arith.maximumf %286, %287 : vector<16x1xf32>
    %289 = vector.broadcast %288 : vector<16x1xf32> to vector<16x8xf32>
    %290 = arith.subf %284, %289 : vector<16x8xf32>
    %291 = math.exp %290 : vector<16x8xf32>
    %cst_106 = arith.constant dense<0.000000e+00> : vector<16xf32>
    %292 = vector.multi_reduction <add>, %291, %cst_106 [1] : vector<16x8xf32> to vector<16xf32>
    %293 = vector.shape_cast %292 : vector<16xf32> to vector<16x1xf32>
    %cst_107 = arith.constant -1.000000e+00 : f32
    %294 = vector.broadcast %cst_107 : f32 to vector<16x1xf32>
    %295 = arith.subf %294, %288 : vector<16x1xf32>
    %296 = math.exp %295 : vector<16x1xf32>
    %297 = arith.addf %293, %296 : vector<16x1xf32>
    %298 = math.log %297 : vector<16x1xf32>
    %299 = arith.addf %288, %298 : vector<16x1xf32>
    %300 = vector.broadcast %299 : vector<16x1xf32> to vector<16x8xf32>
    %301 = arith.subf %284, %300 : vector<16x8xf32>
    %cst_108 = arith.constant -1.000000e+30 : f32
    %302 = vector.broadcast %cst_108 : f32 to vector<16x8xf32>
    %303 = arith.maximumf %301, %302 : vector<16x8xf32>
    %c0_109 = arith.constant 0 : index
    %c0_110 = arith.constant 0 : index
    %304 = vector.load %arg4[%c0_109, %c0_110] : memref<8x128xf32, #tpu.memory_space<vmem>>, vector<8x128xf32>
    %cst_111 = arith.constant dense<0.000000e+00> : vector<16x128xf32>
    %305 = tpu.matmul %303, %304, %cst_111 {dimension_numbers = #tpu.dot_dimension_numbers<[1], [0], [0], [1], [0, 0, 1, 1], [], []>} : vector<16x8xf32>, vector<8x128xf32>, vector<16x128xf32> -> vector<16x128xf32>
    %cst_112 = arith.constant -1.000000e+00 : f32
    %306 = vector.broadcast %cst_112 : f32 to vector<16x1xf32>
    %307 = arith.subf %306, %299 : vector<16x1xf32>
    %308 = vector.shape_cast %307 : vector<16x1xf32> to vector<16x1xf32>
    %309 = vector.broadcast %308 : vector<16x1xf32> to vector<16x128xf32>
    %310 = arith.select %6, %309, %305 : vector<16x128xi1>, vector<16x128xf32>
    %c80 = arith.constant 80 : index
    %c0_113 = arith.constant 0 : index
    %311 = vector.load %arg6[%c80, %c0_113] : memref<128x128xf32, #tpu.memory_space<vmem>>, vector<16x128xf32>
    tpu.vector_store %arg6[%c80, %c0_113], %310 {strides = array<i32>} : memref<128x128xf32, #tpu.memory_space<vmem>>, vector<16x128xf32>,
    %c6_i32 = arith.constant 6 : i32
    %312 = arith.addi %0, %c6_i32 : i32
    %313 = arith.index_cast %312 : i32 to index
    %314 = memref.load %arg1[%313] : memref<8xi32, #tpu.memory_space<smem>>
    %c6_i32_114 = arith.constant 6 : i32
    %315 = arith.addi %0, %c6_i32_114 : i32
    %316 = arith.index_cast %315 : i32 to index
    %317 = memref.load %arg2[%316] : memref<8xi32, #tpu.memory_space<smem>>
    %318 = arith.maxsi %268, %317 : i32
    %c6_i32_115 = arith.constant 6 : i32
    %319 = vector.broadcast %c6_i32_115 : i32 to vector<8x128xi32>
    %320 = arith.cmpi eq, %8, %319 : vector<8x128xi32>
    %c2_i32_116 = arith.constant 2 : i32
    %321 = arith.muli %c2_i32_116, %314 : i32
    %c1_i32_117 = arith.constant 1 : i32
    %322 = arith.addi %321, %c1_i32_117 : i32
    %323 = vector.broadcast %322 : i32 to vector<8x128xi32>
    %324 = arith.select %320, %323, %274 : vector<8x128xi1>, vector<8x128xi32>
    %c6_i32_118 = arith.constant 6 : i32
    %325 = vector.broadcast %c6_i32_118 : i32 to vector<8x128xi32>
    %326 = arith.cmpi eq, %8, %325 : vector<8x128xi32>
    %327 = vector.broadcast %317 : i32 to vector<8x128xi32>
    %328 = arith.select %326, %327, %278 : vector<8x128xi1>, vector<8x128xi32>
    %c6 = arith.constant 6 : index
    %c0_119 = arith.constant 0 : index
    %c0_120 = arith.constant 0 : index
    %329 = vector.load %arg3[%c6, %c0_119, %c0_120] : memref<8x16x8xf32, #tpu.memory_space<vmem>>, vector<1x16x8xf32>
    %330 = vector.shape_cast %329 : vector<1x16x8xf32> to vector<16x8xf32>
    %331 = vector.broadcast %314 : i32 to vector<16x8xi32>
    %332 = arith.cmpi slt, %1, %331 : vector<16x8xi32>
    %cst_121 = arith.constant 0xFF800000 : f32
    %333 = vector.broadcast %cst_121 : f32 to vector<16x8xf32>
    %334 = arith.select %332, %330, %333 : vector<16x8xi1>, vector<16x8xf32>
    %cst_122 = arith.constant dense<0xFF800000> : vector<16xf32>
    %335 = vector.multi_reduction <maximumf>, %334, %cst_122 [1] : vector<16x8xf32> to vector<16xf32>
    %336 = vector.shape_cast %335 : vector<16xf32> to vector<16x1xf32>
    %cst_123 = arith.constant -1.000000e+00 : f32
    %337 = vector.broadcast %cst_123 : f32 to vector<16x1xf32>
    %338 = arith.maximumf %336, %337 : vector<16x1xf32>
    %339 = vector.broadcast %338 : vector<16x1xf32> to vector<16x8xf32>
    %340 = arith.subf %334, %339 : vector<16x8xf32>
    %341 = math.exp %340 : vector<16x8xf32>
    %cst_124 = arith.constant dense<0.000000e+00> : vector<16xf32>
    %342 = vector.multi_reduction <add>, %341, %cst_124 [1] : vector<16x8xf32> to vector<16xf32>
    %343 = vector.shape_cast %342 : vector<16xf32> to vector<16x1xf32>
    %cst_125 = arith.constant -1.000000e+00 : f32
    %344 = vector.broadcast %cst_125 : f32 to vector<16x1xf32>
    %345 = arith.subf %344, %338 : vector<16x1xf32>
    %346 = math.exp %345 : vector<16x1xf32>
    %347 = arith.addf %343, %346 : vector<16x1xf32>
    %348 = math.log %347 : vector<16x1xf32>
    %349 = arith.addf %338, %348 : vector<16x1xf32>
    %350 = vector.broadcast %349 : vector<16x1xf32> to vector<16x8xf32>
    %351 = arith.subf %334, %350 : vector<16x8xf32>
    %cst_126 = arith.constant -1.000000e+30 : f32
    %352 = vector.broadcast %cst_126 : f32 to vector<16x8xf32>
    %353 = arith.maximumf %351, %352 : vector<16x8xf32>
    %c0_127 = arith.constant 0 : index
    %c0_128 = arith.constant 0 : index
    %354 = vector.load %arg4[%c0_127, %c0_128] : memref<8x128xf32, #tpu.memory_space<vmem>>, vector<8x128xf32>
    %cst_129 = arith.constant dense<0.000000e+00> : vector<16x128xf32>
    %355 = tpu.matmul %353, %354, %cst_129 {dimension_numbers = #tpu.dot_dimension_numbers<[1], [0], [0], [1], [0, 0, 1, 1], [], []>} : vector<16x8xf32>, vector<8x128xf32>, vector<16x128xf32> -> vector<16x128xf32>
    %cst_130 = arith.constant -1.000000e+00 : f32
    %356 = vector.broadcast %cst_130 : f32 to vector<16x1xf32>
    %357 = arith.subf %356, %349 : vector<16x1xf32>
    %358 = vector.shape_cast %357 : vector<16x1xf32> to vector<16x1xf32>
    %359 = vector.broadcast %358 : vector<16x1xf32> to vector<16x128xf32>
    %360 = arith.select %6, %359, %355 : vector<16x128xi1>, vector<16x128xf32>
    %c96 = arith.constant 96 : index
    %c0_131 = arith.constant 0 : index
    %361 = vector.load %arg6[%c96, %c0_131] : memref<128x128xf32, #tpu.memory_space<vmem>>, vector<16x128xf32>
    tpu.vector_store %arg6[%c96, %c0_131], %360 {strides = array<i32>} : memref<128x128xf32, #tpu.memory_space<vmem>>, vector<16x128xf32>,
    %c7_i32 = arith.constant 7 : i32
    %362 = arith.addi %0, %c7_i32 : i32
    %363 = arith.index_cast %362 : i32 to index
    %364 = memref.load %arg1[%363] : memref<8xi32, #tpu.memory_space<smem>>
    %c7_i32_132 = arith.constant 7 : i32
    %365 = arith.addi %0, %c7_i32_132 : i32
    %366 = arith.index_cast %365 : i32 to index
    %367 = memref.load %arg2[%366] : memref<8xi32, #tpu.memory_space<smem>>
    %368 = arith.maxsi %318, %367 : i32
    %c7_i32_133 = arith.constant 7 : i32
    %369 = vector.broadcast %c7_i32_133 : i32 to vector<8x128xi32>
    %370 = arith.cmpi eq, %8, %369 : vector<8x128xi32>
    %c2_i32_134 = arith.constant 2 : i32
    %371 = arith.muli %c2_i32_134, %364 : i32
    %c1_i32_135 = arith.constant 1 : i32
    %372 = arith.addi %371, %c1_i32_135 : i32
    %373 = vector.broadcast %372 : i32 to vector<8x128xi32>
    %374 = arith.select %370, %373, %324 : vector<8x128xi1>, vector<8x128xi32>
    %c7_i32_136 = arith.constant 7 : i32
    %375 = vector.broadcast %c7_i32_136 : i32 to vector<8x128xi32>
    %376 = arith.cmpi eq, %8, %375 : vector<8x128xi32>
    %377 = vector.broadcast %367 : i32 to vector<8x128xi32>
    %378 = arith.select %376, %377, %328 : vector<8x128xi1>, vector<8x128xi32>
    %c7 = arith.constant 7 : index
    %c0_137 = arith.constant 0 : index
    %c0_138 = arith.constant 0 : index
    %379 = vector.load %arg3[%c7, %c0_137, %c0_138] : memref<8x16x8xf32, #tpu.memory_space<vmem>>, vector<1x16x8xf32>
    %380 = vector.shape_cast %379 : vector<1x16x8xf32> to vector<16x8xf32>
    %381 = vector.broadcast %364 : i32 to vector<16x8xi32>
    %382 = arith.cmpi slt, %1, %381 : vector<16x8xi32>
    %cst_139 = arith.constant 0xFF800000 : f32
    %383 = vector.broadcast %cst_139 : f32 to vector<16x8xf32>
    %384 = arith.select %382, %380, %383 : vector<16x8xi1>, vector<16x8xf32>
    %cst_140 = arith.constant dense<0xFF800000> : vector<16xf32>
    %385 = vector.multi_reduction <maximumf>, %384, %cst_140 [1] : vector<16x8xf32> to vector<16xf32>
    %386 = vector.shape_cast %385 : vector<16xf32> to vector<16x1xf32>
    %cst_141 = arith.constant -1.000000e+00 : f32
    %387 = vector.broadcast %cst_141 : f32 to vector<16x1xf32>
    %388 = arith.maximumf %386, %387 : vector<16x1xf32>
    %389 = vector.broadcast %388 : vector<16x1xf32> to vector<16x8xf32>
    %390 = arith.subf %384, %389 : vector<16x8xf32>
    %391 = math.exp %390 : vector<16x8xf32>
    %cst_142 = arith.constant dense<0.000000e+00> : vector<16xf32>
    %392 = vector.multi_reduction <add>, %391, %cst_142 [1] : vector<16x8xf32> to vector<16xf32>
    %393 = vector.shape_cast %392 : vector<16xf32> to vector<16x1xf32>
    %cst_143 = arith.constant -1.000000e+00 : f32
    %394 = vector.broadcast %cst_143 : f32 to vector<16x1xf32>
    %395 = arith.subf %394, %388 : vector<16x1xf32>
    %396 = math.exp %395 : vector<16x1xf32>
    %397 = arith.addf %393, %396 : vector<16x1xf32>
    %398 = math.log %397 : vector<16x1xf32>
    %399 = arith.addf %388, %398 : vector<16x1xf32>
    %400 = vector.broadcast %399 : vector<16x1xf32> to vector<16x8xf32>
    %401 = arith.subf %384, %400 : vector<16x8xf32>
    %cst_144 = arith.constant -1.000000e+30 : f32
    %402 = vector.broadcast %cst_144 : f32 to vector<16x8xf32>
    %403 = arith.maximumf %401, %402 : vector<16x8xf32>
    %c0_145 = arith.constant 0 : index
    %c0_146 = arith.constant 0 : index
    %404 = vector.load %arg4[%c0_145, %c0_146] : memref<8x128xf32, #tpu.memory_space<vmem>>, vector<8x128xf32>
    %cst_147 = arith.constant dense<0.000000e+00> : vector<16x128xf32>
    %405 = tpu.matmul %403, %404, %cst_147 {dimension_numbers = #tpu.dot_dimension_numbers<[1], [0], [0], [1], [0, 0, 1, 1], [], []>} : vector<16x8xf32>, vector<8x128xf32>, vector<16x128xf32> -> vector<16x128xf32>
    %cst_148 = arith.constant -1.000000e+00 : f32
    %406 = vector.broadcast %cst_148 : f32 to vector<16x1xf32>
    %407 = arith.subf %406, %399 : vector<16x1xf32>
    %408 = vector.shape_cast %407 : vector<16x1xf32> to vector<16x1xf32>
    %409 = vector.broadcast %408 : vector<16x1xf32> to vector<16x128xf32>
    %410 = arith.select %6, %409, %405 : vector<16x128xi1>, vector<16x128xf32>
    %c112 = arith.constant 112 : index
    %c0_149 = arith.constant 0 : index
    %411 = vector.load %arg6[%c112, %c0_149] : memref<128x128xf32, #tpu.memory_space<vmem>>, vector<16x128xf32>
    tpu.vector_store %arg6[%c112, %c0_149], %410 {strides = array<i32>} : memref<128x128xf32, #tpu.memory_space<vmem>>, vector<16x128xf32>,
    %c16_i32 = arith.constant 16 : i32
    %412 = arith.minsi %368, %c16_i32 : i32
    %c3_i32_150 = arith.constant 3 : i32
    %413 = vector.broadcast %c3_i32_150 : i32 to vector<8x128xi32>
    %414 = arith.cmpi sge, %7, %413 : vector<8x128xi32>
    %c1_i32_151 = arith.constant 1 : i32
    %415 = vector.broadcast %c1_i32_151 : i32 to vector<8x128xi32>
    %416 = arith.andi %7, %415 : vector<8x128xi32>
    %c1_i32_152 = arith.constant 1 : i32
    %417 = vector.broadcast %c1_i32_152 : i32 to vector<8x128xi32>
    %418 = arith.cmpi eq, %416, %417 : vector<8x128xi32>
    %419 = arith.andi %414, %418 : vector<8x128xi1>
    %420 = arith.cmpi slt, %7, %374 : vector<8x128xi32>
    %c2_i32_153 = arith.constant 2 : i32
    %421 = vector.broadcast %c2_i32_153 : i32 to vector<8x128xi32>
    %422 = arith.subi %374, %421 : vector<8x128xi32>
    %423 = arith.cmpi sge, %7, %422 : vector<8x128xi32>
    %424 = arith.andi %420, %423 : vector<8x128xi1>
    %c0_154 = arith.constant 0 : index
    %c0_155 = arith.constant 0 : index
    %425 = tpu.strided_load %arg6[%c0_154, %c0_155] {strides = array<i32: 16, 1>} : memref<128x128xf32, #tpu.memory_space<vmem>>, vector<8x128xf32>
    %c1_i32_156 = arith.constant 1 : i32
    %426 = vector.broadcast %c1_i32_156 : i32 to vector<8x128xi32>
    %427 = arith.cmpi sle, %7, %426 : vector<8x128xi32>
    %428 = arith.andi %427, %420 : vector<8x128xi1>
    %429 = arith.select %428, %425, %9 : vector<8x128xi1>, vector<8x128xf32>
    %c1_i32_157 = arith.constant 1 : i32
    %430 = arith.subi %412, %c1_i32_157 : i32
    %431 = arith.addi %c1_i32_157, %430 : i32
    %c1_i32_158 = arith.constant 1 : i32
    %432 = scf.for %arg7 = %c1_i32_157 to %431 step %c1_i32_158 iter_args(%arg8 = %429) -> (vector<8x128xf32>)  : i32 {
      %446 = arith.index_cast %arg7 : i32 to index
      %c0_164 = arith.constant 0 : index
      %447 = tpu.strided_load %arg6[%446, %c0_164] {strides = array<i32: 16, 1>} : memref<128x128xf32, #tpu.memory_space<vmem>>, vector<8x128xf32>
      %448 = vector.broadcast %arg7 : i32 to vector<8x128xi32>
      %449 = arith.cmpi slt, %448, %378 : vector<8x128xi32>
      %450 = arith.andi %420, %449 : vector<8x128xi1>
      %c1_i32_165 = arith.constant 1 : i32
      %451 = tpu.dynamic_rotate %arg8 by %c1_i32_165 dim 1 : vector<8x128xf32>, i32 -> vector<8x128xf32>
      %c2_i32_166 = arith.constant 2 : i32
      %452 = tpu.dynamic_rotate %arg8 by %c2_i32_166 dim 1 : vector<8x128xf32>, i32 -> vector<8x128xf32>
      %453 = arith.select %419, %452, %9 : vector<8x128xi1>, vector<8x128xf32>
      %454 = arith.maximumf %arg8, %451 : vector<8x128xf32>
      %455 = arith.maximumf %454, %453 : vector<8x128xf32>
      %456 = arith.subf %arg8, %455 : vector<8x128xf32>
      %457 = math.exp %456 : vector<8x128xf32>
      %458 = arith.subf %451, %455 : vector<8x128xf32>
      %459 = math.exp %458 : vector<8x128xf32>
      %460 = arith.addf %457, %459 : vector<8x128xf32>
      %461 = arith.subf %453, %455 : vector<8x128xf32>
      %462 = math.exp %461 : vector<8x128xf32>
      %463 = arith.addf %460, %462 : vector<8x128xf32>
      %464 = math.log %463 : vector<8x128xf32>
      %465 = arith.addf %455, %464 : vector<8x128xf32>
      %466 = arith.addf %465, %447 : vector<8x128xf32>
      %cst_167 = arith.constant -1.000000e+30 : f32
      %467 = vector.broadcast %cst_167 : f32 to vector<8x128xf32>
      %468 = arith.maximumf %466, %467 : vector<8x128xf32>
      %469 = arith.select %450, %468, %arg8 : vector<8x128xi1>, vector<8x128xf32>
      scf.yield %469 : vector<8x128xf32>
    }
    %433 = arith.select %424, %432, %9 : vector<8x128xi1>, vector<8x128xf32>
    %cst_159 = arith.constant dense<0xFF800000> : vector<8xf32>
    %434 = vector.multi_reduction <maximumf>, %433, %cst_159 [1] : vector<8x128xf32> to vector<8xf32>
    %435 = vector.shape_cast %434 : vector<8xf32> to vector<8x1xf32>
    %436 = vector.broadcast %435 : vector<8x1xf32> to vector<8x128xf32>
    %437 = arith.subf %433, %436 : vector<8x128xf32>
    %438 = math.exp %437 : vector<8x128xf32>
    %cst_160 = arith.constant dense<0.000000e+00> : vector<8xf32>
    %439 = vector.multi_reduction <add>, %438, %cst_160 [1] : vector<8x128xf32> to vector<8xf32>
    %440 = vector.shape_cast %439 : vector<8xf32> to vector<8x1xf32>
    %441 = math.log %440 : vector<8x1xf32>
    %442 = arith.addf %435, %441 : vector<8x1xf32>
    %cst_161 = arith.constant 0.000000e+00 : f32
    %443 = vector.broadcast %cst_161 : f32 to vector<8x1xf32>
    %444 = arith.subf %443, %442 : vector<8x1xf32>
    %c0_162 = arith.constant 0 : index
    %c0_163 = arith.constant 0 : index
    %445 = vector.load %arg5[%c0_162, %c0_163] : memref<8x1xf32, #tpu.memory_space<vmem>>, vector<8x1xf32>
    tpu.vector_store %arg5[%c0_162, %c0_163], %444 {strides = array<i32>} : memref<8x1xf32, #tpu.memory_space<vmem>>, vector<8x1xf32>,
    return
  }
  func.func @transform_0(%arg0: i32, %arg1: memref<8xi32, #tpu.memory_space<smem>>, %arg2: memref<8xi32, #tpu.memory_space<smem>>) -> (i32, i32, i32) {
    %c0_i32 = arith.constant 0 : i32
    %c0_i32_0 = arith.constant 0 : i32
    %c0_i32_1 = arith.constant 0 : i32
    return %arg0, %c0_i32, %c0_i32_0 : i32, i32, i32
  }
  func.func @transform_1(%arg0: i32, %arg1: memref<8xi32, #tpu.memory_space<smem>>, %arg2: memref<8xi32, #tpu.memory_space<smem>>) -> (i32, i32) {
    %c0_i32 = arith.constant 0 : i32
    %c0_i32_0 = arith.constant 0 : i32
    %c0_i32_1 = arith.constant 0 : i32
    return %c0_i32, %c0_i32_0 : i32, i32
  }
  func.func @transform_2(%arg0: i32, %arg1: memref<8xi32, #tpu.memory_space<smem>>, %arg2: memref<8xi32, #tpu.memory_space<smem>>) -> (i32, i32) {
    %c0_i32 = arith.constant 0 : i32
    %c0_i32_0 = arith.constant 0 : i32
    return %arg0, %c0_i32 : i32, i32
  }
}

</mosaic_0001>

<bundles_post_ra>
// kernel: tpu_custom_call.1
= control target key start
LH: loop header
LB: loop body
LE: loop exit
PB: predicated region body
PF: predicated region fallthrough
CT: control target
= control target key end

     0   :  { %s1107_s21 = smov [#allocation4]   ;;  %s1108_s22 = smov [#allocation5]   ;;  %s1740_s0 = inlined_call_operand.vmem [shape: s32[8], index: 0, kind: input, shape index: {}]   ;;  %s1741_s2 = inlined_call_operand.vmem [shape: f32[8,16,8], index: 2, kind: input, shape index: {}]   ;;  %s1742_s3 = inlined_call_operand.vmem [shape: f32[8,128], index: 3, kind: input, shape index: {}]   ;;  %s1743_s4 = inlined_call_operand.vmem [shape: f32[8,1], index: 4, kind: output, shape index: {}]   ;;  %s1744_s1 = inlined_call_operand.vmem [shape: s32[8], index: 1, kind: input, shape index: {}]  }
   0x1   :  { %s10_s17 = sshll.u32 %s1740_s0, 4  ;;  %s15_s20 = sshll.u32 %s1744_s1, 4  ;;  %s11_s17 = int_to_ptr.vmem [resolvable:$true] %s10_s17  ;;  %s16_s20 = int_to_ptr.vmem [resolvable:$true] %s15_s20 }
   0x2   :  { %13 = dma.vmem_to_smem %s11_s17, 16, %s1107_s21, [#allocation3] }
   0x3   :  { %18 = dma.vmem_to_smem %s16_s20, 16, %s1108_s22, [#allocation3] }
   0x4   :  { %1093 = dma.done.wait [#allocation3], 32 }
   0x5   :  { %1094 = vsyncadd [#allocation3], 4294967264 }
   0x6   :  { %21 = sfence }
   0x7   :  { %v27_v0 = vlaneseq  ;;  %s874_s23 = sld [smem:[#allocation4 + $0x2]]  ;;  %v878_v3 = vld [vmem:[%s1741_s2 + $0x28] sm:$0xff]  ;;  %v877_v4 = vld [vmem:[%s1741_s2 + $0x20] sm:$0xff]  ;;  %vm50_vm0 = vcmask 64512   ;;  %v885_v15 = vld [vmem:[%s1741_s2 + $0x38] sm:$0xff] }
   0x8   :  { %s1142_s24 = sld [smem:[#allocation4]]  ;;  %v44_v9 = vld [vmem:[%s1741_s2] sm:$0xff]  ;;  %v884_v16 = vld [vmem:[%s1741_s2 + $0x30] sm:$0xff]  ;;  %v45_v38 = vld [vmem:[%s1741_s2 + $0x8] sm:$0xff] }
   0x9   :  { %s1144_s0 = sld [smem:[#allocation5]]  ;;  %v1146_v1 = vand.u32 127, %v27_v0  ;;  %v1148_v2 = vshrl.u32 %v27_v0, 7  ;;  %v870_v20 = vld [vmem:[%s1741_s2 + $0x10] sm:$0xff]  ;;  %v905_v36 = vld [vmem:[%s1741_s2 + $0x60] sm:$0xff]  ;;  %v871_v46 = vld [vmem:[%s1741_s2 + $0x18] sm:$0xff] }
   0xa   :  { %s1150_s1 = sld [smem:[#allocation5 + $0x1]]  ;;  %v898_v54 = vld [vmem:[%s1741_s2 + $0x50] sm:$0xff]  ;;  %v899_v37 = vld [vmem:[%s1741_s2 + $0x58] sm:$0xff] }
   0xb   :  { %s1158_s29 = sld [smem:[#allocation4 + $0x3]]  ;;  %vm37_vm2 = vcmp.eq.s32.totalorder %v1148_v2, 0  ;;  %vm130_vm6 = vcmp.eq.s32.totalorder %v1148_v2, 1  ;;  %vm223_vm7 = vcmp.eq.s32.totalorder %v1148_v2, 2  ;;  %vm316_vm8 = vcmp.eq.s32.totalorder %v1148_v2, 3  ;;  %v912_v56 = vld [vmem:[%s1741_s2 + $0x70] sm:$0xff] }
   0xc   :  { %s1160_s5 = sld [smem:[#allocation4 + $0x1]]  ;;  %vm409_vm12 = vcmp.eq.s32.totalorder %v1148_v2, 4  ;;  %vm502_vm13 = vcmp.eq.s32.totalorder %v1148_v2, 5  ;;  %vm595_vm14 = vcmp.eq.s32.totalorder %v1148_v2, 6  ;;  %vm688_vm15 = vcmp.eq.s32.totalorder %v1148_v2, 7 }
   0xd   :  { %s876_s30 = sshll.u32 %s874_s23, 1  ;;  %v233_v5 = vstv %s874_s23  ;;  %s1166_s7 = sld [smem:[#allocation5 + $0x2]] }
   0xe   :  { %vm234_vm1 = vcmp.lt.s32.totalorder %v1146_v1, %v233_v5  ;;  %s864_s6 = sshll.u32 %s1142_s24, 1  ;;  %v46_v6 = vstv %s1142_s24  ;;  %s1176_s11 = sadd.s32 1, %s876_s30 }
   0xf   :  { %v1168_v7 = vsel %vm234_vm1, %v878_v3, -inf  ;;  %v1170_v8 = vsel %vm234_vm1, %v877_v4, -inf  ;;  %p35_p0 = scmp.gt.s32.totalorder %s1144_s0, 1  ;;  %s39_s8 = sadd.s32 1, %s864_s6  ;;  %vm1188_vm3 = vcmp.lt.s32.totalorder %v1146_v1, %v46_v6  ;;  %v42_v22 = vstv %s1144_s0 }
  0x10   :  { %v240_v10 = vsel %vm50_vm0, %v1168_v7, -inf  ;;  %v237_v11 = vsel %vm50_vm0, %v1170_v8, -inf  ;;  %v40_v12 = vstv %s39_s8  ;;  %s1182_s12 = sld [smem:[#allocation4 + $0x6]]  ;;  %v1200_v17 = vsel %vm1188_vm3, %v44_v9, -inf }
  0x11   :  { %241 = vmax.xlane.f32.xlu2 %v240_v10  ;;  %238 = vmax.xlane.f32.xlu0 %v237_v11  ;;  %s36_s13 = scalar_select %p35_p0, %s1144_s0, 1  ;;  %v41_v13 = vsel %vm37_vm2, %v40_v12, 0  ;;  %v326_v18 = vstv %s1158_s29  ;;  %v51_v19 = vsel %vm50_vm0, %v1200_v17, -inf  ;;  %v226_v26 = vstv %s1176_s11  ;;  %v891_v10 = vld [vmem:[%s1741_s2 + $0x40] sm:$0xff] }
  0x12   :  { %s883_s18 = sshll.u32 %s1158_s29, 1  ;;  %s1204_s19 = sld [smem:[#allocation4 + $0x5]]  ;;  %vm327_vm4 = vcmp.lt.s32.totalorder %v1146_v1, %v326_v18  ;;  %v140_v21 = vstv %s1160_s5  ;;  %52 = vmax.xlane.f32.xlu1 %v51_v19  ;;  %v43_v31 = vsel %vm37_vm2, %v42_v22, 0  ;;  %v135_v32 = vstv %s1150_s1 }
  0x13   :  { %p128_p1 = scmp.gt.s32.totalorder %s36_s13, %s1150_s1  ;;  %s1209_s20 = sadd.s32 1, %s883_s18  ;;  %v1217_v23 = vsel %vm327_vm4, %v885_v15, -inf  ;;  %v1219_v24 = vsel %vm327_vm4, %v884_v16, -inf  ;;  %vm1223_vm5 = vcmp.lt.s32.totalorder %v1146_v1, %v140_v21  ;;  %v136_v41 = vsel %vm130_vm6, %v135_v32, %v43_v31 }
  0x14   :  { %s869_s23 = sshll.u32 %s1160_s5, 1  ;;  %s1227_s24 = sld [smem:[#allocation4 + $0x7]]  ;;  %v333_v27 = vsel %vm50_vm0, %v1217_v23, -inf  ;;  %v330_v28 = vsel %vm50_vm0, %v1219_v24, -inf  ;;  %v1240_v29 = vsel %vm1223_vm5, %v870_v20, -inf  ;;  %v319_v33 = vstv %s1209_s20 }
  0x15   :  { %s1764_s13 = smov (!%p128_p1, %s36_s13), %s1150_s1  ;;  %s132_s0 = sadd.s32 1, %s869_s23  ;;  %v144_v39 = vsel %vm50_vm0, %v1240_v29, -inf  ;;  %v228_v42 = vstv %s1166_s7  ;;  %v1284_v45 = vsel %vm1188_vm3, %v45_v38, -inf  ;;  %v1307_v52 = vsel %vm1223_vm5, %v871_v46, -inf }
  0x16   :  { %v605_v30 = vstv %s1182_s12  ;;  %p221_p2 = scmp.gt.s32.totalorder %s1764_s13, %s1166_s7  ;;  %v133_v34 = vstv %s132_s0  ;;  %s904_s25 = sshll.u32 %s1182_s12, 1  ;;  %v229_v49 = vsel %vm223_vm7, %v228_v42, %v136_v41  ;;  %v54_v51 = vsel %vm50_vm0, %v1284_v45, -inf }
  0x17   :  { %v134_v35 = vsel %vm130_vm6, %v133_v34, %v41_v13  ;;  %vm1255_vm9 = vcmp.lt.s32.totalorder %v1146_v1, %v605_v30  ;;  %s1262_s1 = sld [smem:[#allocation5 + $0x3]]  ;;  %s1276_s30 = sadd.s32 1, %s904_s25  ;;  %v147_v60 = vsel %vm50_vm0, %v1307_v52, -inf  ;;  %v906_v30 = vld [vmem:[%s1741_s2 + $0x68] sm:$0xff]  ;;  %v913_v34 = vld [vmem:[%s1741_s2 + $0x78] sm:$0xff]  ;;  %vm778_vm5 = vcmp.ge.s32.totalorder %v1146_v1, 3 }
  0x18   :  { %v227_v40 = vsel %vm223_vm7, %v226_v26, %v134_v35  ;;  %s1766_s13 = smov (!%p221_p2, %s1764_s13), %s1166_s7  ;;  %v1280_v44 = vsel %vm1255_vm9, %v905_v36, -inf  ;;  %s1289_s7 = sld [smem:[#allocation4 + $0x4]]  ;;  %v512_v47 = vstv %s1204_s19  ;;  %v598_v59 = vstv %s1276_s30 }
  0x19   :  { %334 = vmax.xlane.f32.xlu2 %v333_v27  ;;  %331 = vmax.xlane.f32.xlu0 %v330_v28  ;;  %v320_v43 = vsel %vm316_vm8, %v319_v33, %v227_v40  ;;  %s897_s8 = sshll.u32 %s1204_s19, 1  ;;  %s1294_s9 = sld [smem:[#allocation5 + $0x4]]  ;;  %v609_v50 = vsel %vm50_vm0, %v1280_v44, -inf  ;;  %vm1319_vm10 = vcmp.lt.s32.totalorder %v1146_v1, %v512_v47  ;;  %v892_v27 = vld [vmem:[%s1741_s2 + $0x48] sm:$0xff]  ;;  %v1427_v33 = vsel %vm1255_vm9, %v906_v30, -inf }
  0x1a   :  { %145 = vmax.xlane.f32.xlu1 %v144_v39  ;;  %v698_v48 = vstv %s1227_s24  ;;  %s911_s10 = sshll.u32 %s1227_s24, 1  ;;  %s1299_s11 = sld [smem:[#allocation5 + $0x5]]  ;;  %v1350_v63 = vsel %vm1319_vm10, %v898_v54, -inf  ;;  %v612_v36 = vsel %vm50_vm0, %v1427_v33, -inf  ;;  %v1453_v40 = vsel %vm1319_vm10, %v899_v37, -inf }
  0x1b   :  { %s1311_s12 = sld [smem:[#allocation5 + $0x6]]  ;;  %s1313_s14 = sadd.s32 1, %s897_s8  ;;  %vm1327_vm11 = vcmp.lt.s32.totalorder %v1146_v1, %v698_v48  ;;  %v516_v15 = vsel %vm50_vm0, %v1350_v63, -inf  ;;  %v519_v41 = vsel %vm50_vm0, %v1453_v40, -inf }
  0x1c   :  { %s1331_s19 = sld [smem:[#allocation5 + $0x7]]  ;;  %s1340_s20 = sadd.s32 1, %s911_s10  ;;  %v505_v62 = vstv %s1313_s14  ;;  %v1354_v0 = vsel %vm1327_vm11, %v912_v56, -inf  ;;  %v1440_v38 = vsel %vm1327_vm11, %v913_v34, -inf }
  0x1d   :  { %p314_p3 = scmp.gt.s32.totalorder %s1766_s13, %s1262_s1  ;;  %v321_v53 = vstv %s1262_s1  ;;  %v691_v11 = vstv %s1340_s20  ;;  %v702_v20 = vsel %vm50_vm0, %v1354_v0, -inf  ;;  %v705_v39 = vsel %vm50_vm0, %v1440_v38, -inf }
  0x1e   :  { %v322_v58 = vsel %vm316_vm8, %v321_v53, %v229_v49  ;;  %s890_s21 = sshll.u32 %s1289_s7, 1  ;;  %v419_v61 = vstv %s1289_s7 }
  0x1f   :  { %s1768_s13 = smov (!%p314_p3, %s1766_s13), %s1262_s1  ;;  %s411_s22 = sadd.s32 1, %s890_s21  ;;  %v414_v3 = vstv %s1294_s9  ;;  %vm1361_vm1 = vcmp.lt.s32.totalorder %v1146_v1, %v419_v61 }
  0x20   :  { %p407_p4 = scmp.gt.s32.totalorder %s1768_s13, %s1294_s9  ;;  %v412_v4 = vstv %s411_s22  ;;  %v415_v5 = vsel %vm409_vm12, %v414_v3, %v322_v58  ;;  %v507_v9 = vstv %s1299_s11  ;;  %v1394_v25 = vsel %vm1361_vm1, %v891_v10, -inf }
  0x21   :  { %610 = vmax.xlane.f32.xlu2 %v609_v50  ;;  %55 = vmax.xlane.f32.xlu0 %v54_v51  ;;  %v413_v12 = vsel %vm409_vm12, %v412_v4, %v320_v43  ;;  %v508_v13 = vsel %vm502_vm13, %v507_v9, %v415_v5  ;;  %v600_v14 = vstv %s1311_s12  ;;  %v423_v2 = vsel %vm50_vm0, %v1394_v25, -inf }
  0x22   :  { %148 = vmax.xlane.f32.xlu1 %v147_v60  ;;  %s1770_s13 = smov (!%p407_p4, %s1768_s13), %s1294_s9  ;;  %v506_v16 = vsel %vm502_vm13, %v505_v62, %v413_v12  ;;  %v601_v18 = vsel %vm595_vm14, %v600_v14, %v508_v13  ;;  %v693_v19 = vstv %s1331_s19  ;;  %v1416_v31 = vsel %vm1361_vm1, %v892_v27, -inf }
  0x23   :  { %p500_p5 = scmp.gt.s32.totalorder %s1770_s13, %s1299_s11  ;;  %v599_v21 = vsel %vm595_vm14, %v598_v59, %v506_v16  ;;  %v1390_v22 = vsel %vm688_vm15, %v693_v19, %v601_v18  ;;  %v426_v35 = vsel %vm50_vm0, %v1416_v31, -inf }
  0x24   :  { %v1398_v26 = vsel %vm688_vm15, %v691_v11, %v599_v21 }
  0x25   :  { %s1772_s13 = smov (!%p500_p5, %s1770_s13), %s1299_s11  ;;  %v916_v28 = vadd.s32 4294967294, %v1398_v26  ;;  %vm781_vm2 = vcmp.lt.s32.totalorder %v1146_v1, %v1398_v26 }
  0x26   :  { %p593_p6 = scmp.gt.s32.totalorder %s1772_s13, %s1311_s12 }
  0x27   :  { %vm783_vm3 = vcmp.ge.s32.totalorder %v1146_v1, %v916_v28 }
  0x28   :  { %vm1421_vm4 = vmand %vm781_vm2, %vm783_vm3  ;;  %s1774_s13 = smov (!%p593_p6, %s1772_s13), %s1311_s12 }
  0x29   :  { %517 = vmax.xlane.f32.xlu2 %v516_v15  ;;  %703 = vmax.xlane.f32.xlu0 %v702_v20  ;;  %p686_p7 = scmp.gt.s32.totalorder %s1774_s13, %s1331_s19 }
  0x2a   :  { %424 = vmax.xlane.f32.xlu1 %v423_v2 }
  0x2b   :  { %s1776_s13 = smov (!%p686_p7, %s1774_s13), %s1331_s19 }
  0x2c   :  { %p776_p8 = scmp.lt.s32.totalorder %s1776_s13, 16  ;;  %p918_p9 = scmp.le.s32.totalorder %s1776_s13, 1 }
  0x2e   :  { %s1456_s5 = scalar_select %p776_p8, %s1776_s13, 16 }
  0x31   :  { %427 = vmax.xlane.f32.xlu2 %v426_v35  ;;  %613 = vmax.xlane.f32.xlu0 %v612_v36 }
  0x32   :  { %706 = vmax.xlane.f32.xlu1 %v705_v39 }
  0x39   :  { %520 = vmax.xlane.f32.xlu0 %v519_v41 }
  0x84   :  { %v242_v42 = vpop.xlane.xlu2 %241  ;;  %v239_v43 = vpop.xlane.xlu0 %238 }
  0x85   :  { %v1460_v46 = vmax.f32 %v239_v43, -1.0  ;;  %v53_v48 = vpop.xlane.xlu1 %52  ;;  %v1472_v58 = vmax.f32 %v242_v42, -1.0 }
  0x86   :  { %v1464_v49 = vmax.f32 %v53_v48, -1.0 }
  0x87   :  { %v245_v47 = vsub.f32 %v1170_v8, %v1460_v46  ;;  %v246_v5 = vsub.f32 %v1168_v7, %v1472_v58 }
  0x88   :  { %v59_v51 = vsub.f32 %v1200_v17, %v1464_v49 }
  0x89   :  { %v247_v50 = vmul.f32 1.442695, %v245_v47  ;;  %v249_v18 = vmul.f32 1.442695, %v246_v5 }
  0x8a   :  { %v61_v53 = vmul.f32 1.442695, %v59_v51 }
  0x8b   :  { %949 = vpow2.f32 %v247_v50 }
  0x8c   :  { %v335_v54 = vpop.xlane.xlu2 %334  ;;  %v332_v55 = vpop.xlane.xlu0 %331  ;;  %951 = vpow2.f32 %v61_v53 }
  0x8d   :  { %v1468_v56 = vmax.f32 %v335_v54, -1.0  ;;  %v1470_v57 = vmax.f32 %v332_v55, -1.0  ;;  %v146_v61 = vpop.xlane.xlu1 %145 }
  0x8e   :  { %v1478_v62 = vmax.f32 %v146_v61, -1.0 }
  0x8f   :  { %v339_v59 = vsub.f32 %v1217_v23, %v1468_v56  ;;  %v338_v60 = vsub.f32 %v1219_v24, %v1470_v57 }
  0x90   :  { %v152_v6 = vsub.f32 %v1240_v29, %v1478_v62 }
  0x91   :  { %v342_v3 = vmul.f32 1.442695, %v339_v59  ;;  %v340_v4 = vmul.f32 1.442695, %v338_v60  ;;  %v950_v9 = vpop.eup %949 }
  0x92   :  { %v154_v10 = vmul.f32 1.442695, %v152_v6  ;;  %v251_v11 = vsel %vm50_vm0, %v950_v9, 0.0  ;;  %v952_v14 = vpop.eup %951 }
  0x93   :  { %953 = vpow2.f32 %v342_v3  ;;  %252 = vadd.xlane.f32.xlu1 %v251_v11  ;;  %v65_v19 = vsel %vm50_vm0, %v952_v14, 0.0 }
  0x94   :  { %v611_v12 = vpop.xlane.xlu2 %610  ;;  %v56_v13 = vpop.xlane.xlu0 %55  ;;  %955 = vpow2.f32 %v340_v4  ;;  %66 = vadd.xlane.f32.xlu0 %v65_v19 }
  0x95   :  { %v1485_v15 = vmax.f32 %v611_v12, -1.0  ;;  %v1487_v16 = vmax.f32 %v56_v13, -1.0  ;;  %957 = vpow2.f32 %v154_v10  ;;  %v149_v27 = vpop.xlane.xlu1 %148 }
  0x96   :  { %v1494_v28 = vmax.f32 %v149_v27, -1.0  ;;  %959 = vpow2.f32 %v249_v18 }
  0x97   :  { %v617_v20 = vsub.f32 %v1280_v44, %v1485_v15  ;;  %v60_v21 = vsub.f32 %v1284_v45, %v1487_v16 }
  0x98   :  { %v153_v35 = vsub.f32 %v1307_v52, %v1494_v28 }
  0x99   :  { %v954_v30 = vpop.eup %953  ;;  %v619_v2 = vmul.f32 1.442695, %v617_v20  ;;  %v63_v34 = vmul.f32 1.442695, %v60_v21 }
  0x9a   :  { %v956_v36 = vpop.eup %955  ;;  %v347_v39 = vsel %vm50_vm0, %v954_v30, 0.0  ;;  %v156_v50 = vmul.f32 1.442695, %v153_v35 }
  0x9b   :  { %961 = vpow2.f32 %v619_v2  ;;  %v344_v37 = vsel %vm50_vm0, %v956_v36, 0.0  ;;  %v958_v43 = vpop.eup %957 }
  0x9c   :  { %v518_v41 = vpop.xlane.xlu2 %517  ;;  %v704_v42 = vpop.xlane.xlu0 %703  ;;  %963 = vpow2.f32 %v63_v34  ;;  %345 = vadd.xlane.f32.xlu2 %v344_v37  ;;  %v158_v51 = vsel %vm50_vm0, %v958_v43, 0.0  ;;  %348 = vadd.xlane.f32.xlu0 %v347_v39 }
  0x9d   :  { %v1500_v47 = vmax.f32 %v518_v41, -1.0  ;;  %v1502_v48 = vmax.f32 %v704_v42, -1.0  ;;  %159 = vadd.xlane.f32.xlu1 %v158_v51  ;;  %v425_v55 = vpop.xlane.xlu1 %424  ;;  %v960_v59 = vpop.eup %959  ;;  %965 = vpow2.f32 %v156_v50 }
  0x9e   :  { %v1509_v60 = vmax.f32 %v425_v55, -1.0  ;;  %v254_v9 = vsel %vm50_vm0, %v960_v59, 0.0 }
  0x9f   :  { %v524_v53 = vsub.f32 %v1350_v63, %v1500_v47  ;;  %v710_v54 = vsub.f32 %v1354_v0, %v1502_v48 }
  0xa0   :  { %v431_v5 = vsub.f32 %v1394_v25, %v1509_v60 }
  0xa1   :  { %v962_v61 = vpop.eup %961  ;;  %v526_v3 = vmul.f32 1.442695, %v524_v53  ;;  %v712_v4 = vmul.f32 1.442695, %v710_v54 }
  0xa2   :  { %v964_v6 = vpop.eup %963  ;;  %v623_v10 = vsel %vm50_vm0, %v962_v61, 0.0  ;;  %v433_v19 = vmul.f32 1.442695, %v431_v5 }
  0xa3   :  { %967 = vpow2.f32 %v526_v3  ;;  %v68_v11 = vsel %vm50_vm0, %v964_v6, 0.0  ;;  %v966_v20 = vpop.eup %965 }
  0xa4   :  { %v428_v12 = vpop.xlane.xlu2 %427  ;;  %v614_v13 = vpop.xlane.xlu0 %613  ;;  %969 = vpow2.f32 %v712_v4  ;;  %255 = vadd.xlane.f32.xlu2 %v254_v9  ;;  %624 = vadd.xlane.f32.xlu0 %v623_v10  ;;  %v161_v37 = vsel %vm50_vm0, %v966_v20, 0.0  ;;  %v71_v20 = vsub.f32 -1.0, %v1464_v49 }
  0xa5   :  { %v1516_v14 = vmax.f32 %v428_v12, -1.0  ;;  %v1518_v18 = vmax.f32 %v614_v13, -1.0  ;;  %69 = vadd.xlane.f32.xlu1 %v68_v11  ;;  %v707_v30 = vpop.xlane.xlu1 %706  ;;  %971 = vpow2.f32 %v433_v19  ;;  %v257_v13 = vsub.f32 -1.0, %v1460_v46  ;;  %v89_v19 = vld [vmem:[%s1742_s3] sm:$0xff]  ;;  %s1718_s3 = smov (!%p918_p9), 1  }
  0xa6   :  { %v1524_v2 = vmax.f32 %v707_v30, -1.0  ;;  %111 = vmatpush.msra.mxu0 %v89_v19  ;;  %297 = vmatpush.msra.mxu2 %v89_v19  ;;  %v351_v30 = vsub.f32 -1.0, %v1468_v56 }
  0xa7   :  { %v432_v21 = vsub.f32 %v1416_v31, %v1516_v14  ;;  %v618_v27 = vsub.f32 %v1427_v33, %v1518_v18  ;;  %204 = vmatpush.msra.mxu1 %v89_v19  ;;  %390 = vmatpush.msra.mxu3 %v89_v19 }
  0xa8   :  { %v711_v39 = vsub.f32 %v1440_v38, %v1524_v2  ;;  %669 = vmatpush.msrb.mxu2 %v89_v19  ;;  %483 = vmatpush.msrb.mxu0 %v89_v19 }
  0xa9   :  { %v968_v34 = vpop.eup %967  ;;  %v435_v35 = vmul.f32 1.442695, %v432_v21  ;;  %v621_v36 = vmul.f32 1.442695, %v618_v27  ;;  %v259_v21 = vmul.f32 1.442695, %v257_v13  ;;  %762 = vmatpush.msrb.mxu3 %v89_v19  ;;  %576 = vmatpush.msrb.mxu1 %v89_v19 }
  0xaa   :  { %v970_v41 = vpop.eup %969  ;;  %v530_v42 = vsel %vm50_vm0, %v968_v34, 0.0  ;;  %v714_v53 = vmul.f32 1.442695, %v711_v39  ;;  %v73_v27 = vmul.f32 1.442695, %v71_v20  ;;  %v350_v34 = vsub.f32 -1.0, %v1470_v57 }
  0xab   :  { %973 = vpow2.f32 %v435_v35  ;;  %v716_v43 = vsel %vm50_vm0, %v970_v41, 0.0  ;;  %v972_v54 = vpop.eup %971  ;;  %v164_v35 = vsub.f32 -1.0, %v1478_v62  ;;  %v536_v20 = vsub.f32 -1.0, %v1500_v47 }
  0xac   :  { %v521_v50 = vpop.xlane.xlu0 %520  ;;  %975 = vpow2.f32 %v621_v36  ;;  %162 = vadd.xlane.f32.xlu2 %v161_v37  ;;  %531 = vadd.xlane.f32.xlu0 %v530_v42  ;;  %v437_v3 = vsel %vm50_vm0, %v972_v54, 0.0  ;;  %v354_v36 = vmul.f32 1.442695, %v351_v30  ;;  %v352_v37 = vmul.f32 1.442695, %v350_v34 }
  0xad   :  { %v1531_v51 = vmax.f32 %v521_v50, -1.0  ;;  %717 = vadd.xlane.f32.xlu1 %v716_v43  ;;  %977 = vpow2.f32 %v714_v53  ;;  %v166_v41 = vmul.f32 1.442695, %v164_v35  ;;  %v258_v43 = vsub.f32 -1.0, %v1472_v58 }
  0xae   :  { %v629_v54 = vsub.f32 -1.0, %v1485_v15 }
  0xaf   :  { %v525_v55 = vsub.f32 %v1453_v40, %v1531_v51 }
  0xb1   :  { %v974_v59 = vpop.eup %973  ;;  %v528_v61 = vmul.f32 1.442695, %v525_v55 }
  0xb2   :  { %v976_v4 = vpop.eup %975  ;;  %v440_v5 = vsel %vm50_vm0, %v974_v59, 0.0 }
  0xb3   :  { %979 = vpow2.f32 %v528_v61  ;;  %v626_v6 = vsel %vm50_vm0, %v976_v4, 0.0  ;;  %v978_v9 = vpop.eup %977  ;;  %v72_v61 = vsub.f32 -1.0, %v1487_v16  ;;  %v631_v4 = vmul.f32 1.442695, %v629_v54 }
  0xb4   :  { %438 = vadd.xlane.f32.xlu2 %v437_v3  ;;  %441 = vadd.xlane.f32.xlu0 %v440_v5  ;;  %v719_v11 = vsel %vm50_vm0, %v978_v9, 0.0  ;;  %981 = vpow2.f32 %v259_v21  ;;  %v261_v3 = vmul.f32 1.442695, %v258_v43  ;;  %v538_v43 = vmul.f32 1.442695, %v536_v20 }
  0xb5   :  { %627 = vadd.xlane.f32.xlu1 %v626_v6  ;;  %983 = vpow2.f32 %v73_v27  ;;  %v75_v9 = vmul.f32 1.442695, %v72_v61  ;;  %v443_v61 = vsub.f32 -1.0, %v1509_v60 }
  0xb6   :  { %985 = vpow2.f32 %v354_v36 }
  0xb7   :  { %987 = vpow2.f32 %v352_v37  ;;  %v722_v37 = vsub.f32 -1.0, %v1502_v48 }
  0xb9   :  { %v980_v10 = vpop.eup %979 }
  0xba   :  { %v533_v12 = vsel %vm50_vm0, %v980_v10, 0.0  ;;  %v982_v39 = vpop.eup %981 }
  0xbb   :  { %v984_v53 = vpop.eup %983 }
  0xbc   :  { %720 = vadd.xlane.f32.xlu2 %v719_v11  ;;  %v986_v5 = vpop.eup %985 }
  0xbd   :  { %534 = vadd.xlane.f32.xlu1 %v533_v12  ;;  %v988_v6 = vpop.eup %987  ;;  %v165_v12 = vsub.f32 -1.0, %v1494_v28 }
 0x106   :  { %v253_v42 = vpop.xlane.xlu1 %252 }
 0x107   :  { %v263_v50 = vadd.f32 %v982_v39, %v253_v42  ;;  %v67_v55 = vpop.xlane.xlu0 %66  ;;  %v168_v42 = vmul.f32 1.442695, %v165_v12 }
 0x108   :  { %v77_v59 = vadd.f32 %v984_v53, %v67_v55 }
 0x109   :  { %989 = vlog2.f32 %v263_v50 }
 0x10a   :  { %991 = vpow2.f32 %v166_v41 }
 0x10b   :  { %993 = vlog2.f32 %v77_v59  ;;  %v724_v59 = vmul.f32 1.442695, %v722_v37 }
 0x10c   :  { %995 = vpow2.f32 %v261_v3 }
 0x10d   :  { %997 = vpow2.f32 %v631_v4 }
 0x10f   :  { %v346_v10 = vpop.xlane.xlu2 %345  ;;  %v990_v11 = vpop.eup %989 }
 0x110   :  { %v356_v13 = vadd.f32 %v988_v6, %v346_v10  ;;  %v992_v19 = vpop.eup %991  ;;  %v266_v21 = vmul.f32 0.6931472, %v990_v11  ;;  %v349_v27 = vpop.xlane.xlu0 %348  ;;  %v444_v6 = vsub.f32 -1.0, %v1516_v14  ;;  %v630_v10 = vsub.f32 -1.0, %v1518_v18 }
 0x111   :  { %v160_v30 = vpop.xlane.xlu1 %159  ;;  %v994_v34 = vpop.eup %993  ;;  %v357_v35 = vadd.f32 %v986_v5, %v349_v27  ;;  %v445_v27 = vmul.f32 1.442695, %v443_v61 }
 0x112   :  { %999 = vlog2.f32 %v356_v13  ;;  %v170_v36 = vadd.f32 %v992_v19, %v160_v30  ;;  %v80_v39 = vmul.f32 0.6931472, %v994_v34  ;;  %v1555_v41 = vadd.f32 %v266_v21, %v1460_v46  ;;  %v996_v54 = vpop.eup %995 }
 0x113   :  { %1001 = vpow2.f32 %v75_v9  ;;  %v998_v55 = vpop.eup %997  ;;  %v633_v37 = vmul.f32 1.442695, %v630_v10 }
 0x114   :  { %1003 = vlog2.f32 %v357_v35  ;;  %v1558_v50 = vadd.f32 %v80_v39, %v1464_v49  ;;  %v271_v53 = vsub.f32 %v1170_v8, %v1555_v41  ;;  %v447_v35 = vmul.f32 1.442695, %v444_v6 }
 0x115   :  { %1005 = vlog2.f32 %v170_v36 }
 0x116   :  { %v85_v46 = vsub.f32 %v1200_v17, %v1558_v50  ;;  %v273_v4 = vmax.f32 %v271_v53, -1e+30  ;;  %1007 = vpow2.f32 %v168_v42 }
 0x117   :  { %v256_v3 = vpop.xlane.xlu2 %255  ;;  %1009 = vpow2.f32 %v538_v43 }
 0x118   :  { %v1000_v5 = vpop.eup %999  ;;  %v264_v49 = vadd.f32 %v996_v54, %v256_v3  ;;  %v625_v11 = vpop.xlane.xlu0 %624  ;;  %v87_v13 = vmax.f32 %v85_v46, -1e+30  ;;  %879 = vmatmul.msk.f32.vlgmr.msra.gmra.mxu2 %vm50_vm0, %v273_v4 }
 0x119   :  { %v1002_v9 = vpop.eup %1001  ;;  %v359_v8 = vmul.f32 0.6931472, %v1000_v5  ;;  %v70_v12 = vpop.xlane.xlu1 %69  ;;  %v635_v20 = vadd.f32 %v998_v55, %v625_v11 }
 0x11a   :  { %v1004_v19 = vpop.eup %1003  ;;  %1011 = vlog2.f32 %v264_v49  ;;  %v78_v17 = vadd.f32 %v1002_v9, %v70_v12  ;;  %865 = vmatmul.msk.f32.vlgmr.msra.gmra.mxu0 %vm50_vm0, %v87_v13 }
 0x11b   :  { %v1006_v21 = vpop.eup %1005  ;;  %1013 = vpow2.f32 %v724_v59  ;;  %v1569_v30 = vadd.f32 %v359_v8, %v1470_v57  ;;  %v361_v34 = vmul.f32 0.6931472, %v1004_v19  ;;  %v537_v8 = vsub.f32 -1.0, %v1531_v51 }
 0x11c   :  { %v173_v36 = vmul.f32 0.6931472, %v1006_v21  ;;  %1015 = vlog2.f32 %v635_v20  ;;  %v1008_v42 = vpop.eup %1007 }
 0x11d   :  { %1017 = vlog2.f32 %v78_v17  ;;  %v364_v39 = vsub.f32 %v1219_v24, %v1569_v30  ;;  %v1010_v53 = vpop.eup %1009  ;;  %v1578_v57 = vadd.f32 %v361_v34, %v1468_v56  ;;  %v723_v24 = vsub.f32 -1.0, %v1524_v2 }
 0x11e   :  { %v1575_v43 = vadd.f32 %v173_v36, %v1478_v62  ;;  %1019 = vpow2.f32 %v445_v27  ;;  %v540_v34 = vmul.f32 1.442695, %v537_v8 }
 0x11f   :  { %v163_v54 = vpop.xlane.xlu2 %162  ;;  %v366_v55 = vmax.f32 %v364_v39, -1e+30  ;;  %1021 = vpow2.f32 %v447_v35  ;;  %v365_v12 = vsub.f32 %v1217_v23, %v1578_v57  ;;  %v726_v20 = vmul.f32 1.442695, %v723_v24 }
 0x120   :  { %v1012_v59 = vpop.eup %1011  ;;  %v171_v61 = vadd.f32 %v1008_v42, %v163_v54  ;;  %v178_v3 = vsub.f32 %v1240_v29, %v1575_v43  ;;  %1023 = vpow2.f32 %v633_v37  ;;  %v532_v62 = vpop.xlane.xlu0 %531 }
 0x121   :  { %v1014_v46 = vpop.eup %1013  ;;  %v268_v4 = vmul.f32 0.6931472, %v1012_v59  ;;  %v718_v5 = vpop.xlane.xlu1 %717  ;;  %886 = vmatmul.msk.f32.vlgmr.msra.gmra.mxu3 %vm50_vm0, %v366_v55  ;;  %v542_v56 = vadd.f32 %v1010_v53, %v532_v62  ;;  %v367_v37 = vmax.f32 %v365_v12, -1e+30 }
 0x122   :  { %v1016_v6 = vpop.eup %1015  ;;  %1025 = vlog2.f32 %v171_v61  ;;  %v728_v49 = vadd.f32 %v1014_v46, %v718_v5  ;;  %v180_v9 = vmax.f32 %v178_v3, -1e+30 }
 0x123   :  { %v1018_v10 = vpop.eup %1017  ;;  %v1586_v11 = vadd.f32 %v268_v4, %v1472_v58  ;;  %v638_v29 = vmul.f32 0.6931472, %v1016_v6  ;;  %1027 = vlog2.f32 %v542_v56 }
 0x124   :  { %v82_v13 = vmul.f32 0.6931472, %v1018_v10  ;;  %872 = vmatmul.msk.f32.vlgmr.msra.gmra.mxu1 %vm50_vm0, %v180_v9  ;;  %v1020_v19 = vpop.eup %1019  ;;  %1029 = vlog2.f32 %v728_v49 }
 0x125   :  { %v272_v17 = vsub.f32 %v1168_v7, %v1586_v11  ;;  %v1022_v21 = vpop.eup %1021  ;;  %v1597_v35 = vadd.f32 %v638_v29, %v1485_v15  ;;  %1031 = vpow2.f32 %v726_v20 }
 0x126   :  { %v1594_v27 = vadd.f32 %v82_v13, %v1487_v16  ;;  %v1024_v58 = vpop.eup %1023 }
 0x127   :  { %v439_v23 = vpop.xlane.xlu2 %438  ;;  %v274_v36 = vmax.f32 %v272_v17, -1e+30  ;;  %v643_v46 = vsub.f32 %v1280_v44, %v1597_v35 }
 0x128   :  { %v1026_v39 = vpop.eup %1025  ;;  %v449_v42 = vadd.f32 %v1020_v19, %v439_v23  ;;  %v86_v53 = vsub.f32 %v1284_v45, %v1594_v27  ;;  %v442_v7 = vpop.xlane.xlu0 %441 }
 0x129   :  { %v175_v54 = vmul.f32 0.6931472, %v1026_v39  ;;  %v628_v55 = vpop.xlane.xlu1 %627  ;;  %880 = vmatmul.msk.f32.gmra.mxu2 %vm50_vm0, %v274_v36  ;;  %887 = vmatmul.msk.f32.gmra.mxu3 %vm50_vm0, %v367_v37  ;;  %v1028_v16 = vpop.eup %1027  ;;  %v450_v59 = vadd.f32 %v1022_v21, %v442_v7  ;;  %v645_v56 = vmax.f32 %v643_v46, -1e+30 }
 0x12a   :  { %1033 = vlog2.f32 %v449_v42  ;;  %v636_v15 = vadd.f32 %v1024_v58, %v628_v55  ;;  %v88_v61 = vmax.f32 %v86_v53, -1e+30  ;;  %v1030_v3 = vpop.eup %1029  ;;  %v545_v24 = vmul.f32 0.6931472, %v1028_v16 }
 0x12b   :  { %1035 = vpow2.f32 %v540_v34  ;;  %v1606_v45 = vadd.f32 %v175_v54, %v1494_v28  ;;  %v731_v4 = vmul.f32 0.6931472, %v1030_v3  ;;  %v1032_v6 = vpop.eup %1031 }
 0x12c   :  { %1037 = vlog2.f32 %v450_v59  ;;  %866 = vmatmul.msk.f32.gmra.mxu0 %vm50_vm0, %v88_v61  ;;  %v1615_v49 = vadd.f32 %v545_v24, %v1500_v47  ;;  %v305_v61 = vsub.f32 -1.0, %v1555_v41  ;;  %v212_v24 = vsub.f32 -1.0, %v1575_v43 }
 0x12d   :  { %1039 = vlog2.f32 %v636_v15  ;;  %v179_v62 = vsub.f32 %v1307_v52, %v1606_v45  ;;  %v1612_v5 = vadd.f32 %v731_v4, %v1502_v48  ;;  %v120_v41 = vsub.f32 -1.0, %v1594_v27 }
 0x12e   :  { %v550_v20 = vsub.f32 %v1350_v63, %v1615_v49  ;;  %v306_v43 = vsub.f32 -1.0, %v1586_v11  ;;  %v677_v11 = vsub.f32 -1.0, %v1597_v35 }
 0x12f   :  { %v721_v44 = vpop.xlane.xlu2 %720  ;;  %v181_v9 = vmax.f32 %v179_v62, -1e+30  ;;  %v736_v10 = vsub.f32 %v1354_v0, %v1612_v5 }
 0x130   :  { %v1034_v28 = vpop.eup %1033  ;;  %v729_v8 = vadd.f32 %v1032_v6, %v721_v44  ;;  %v552_v23 = vmax.f32 %v550_v20, -1e+30 }
 0x131   :  { %v1036_v29 = vpop.eup %1035  ;;  %v452_v12 = vmul.f32 0.6931472, %v1034_v28  ;;  %v535_v13 = vpop.xlane.xlu1 %534  ;;  %873 = vmatmul.msk.f32.gmra.mxu1 %vm50_vm0, %v181_v9  ;;  %907 = vmatmul.msk.f32.vlgmr.msrb.gmra.mxu2 %vm50_vm0, %v645_v56  ;;  %v738_v48 = vmax.f32 %v736_v10, -1e+30  ;;  %v399_v28 = vsub.f32 -1.0, %v1578_v57 }
 0x132   :  { %v1038_v52 = vpop.eup %1037  ;;  %1041 = vlog2.f32 %v729_v8  ;;  %v543_v19 = vadd.f32 %v1036_v29, %v535_v13 }
 0x133   :  { %v1040_v47 = vpop.eup %1039  ;;  %v454_v17 = vmul.f32 0.6931472, %v1038_v52  ;;  %v1624_v21 = vadd.f32 %v452_v12, %v1509_v60  ;;  %914 = vmatmul.msk.f32.vlgmr.msrb.gmra.mxu3 %vm50_vm0, %v738_v48  ;;  %v213_v12 = vsub.f32 -1.0, %v1606_v45  ;;  %v770_v45 = vsub.f32 -1.0, %v1612_v5 }
 0x134   :  { %v640_v0 = vmul.f32 0.6931472, %v1040_v47  ;;  %1043 = vlog2.f32 %v543_v19  ;;  %v584_v19 = vsub.f32 -1.0, %v1615_v49 }
 0x135   :  { %v457_v58 = vsub.f32 %v1394_v25, %v1624_v21  ;;  %v1633_v36 = vadd.f32 %v454_v17, %v1516_v14  ;;  %v491_v48 = vsub.f32 -1.0, %v1624_v21 }
 0x136   :  { %v1630_v34 = vadd.f32 %v640_v0, %v1518_v18 }
 0x137   :  { %v459_v37 = vmax.f32 %v457_v58, -1e+30  ;;  %v458_v14 = vsub.f32 %v1416_v31, %v1633_v36  ;;  %v29_v31 = vand.u32 1, %v1146_v1  ;;  %v492_v49 = vsub.f32 -1.0, %v1633_v36 }
 0x138   :  { %v1042_v63 = vpop.eup %1041  ;;  %v644_v60 = vsub.f32 %v1427_v33, %v1630_v34  ;;  %v678_v5 = vsub.f32 -1.0, %v1630_v34 }
 0x139   :  { %v733_v39 = vmul.f32 0.6931472, %v1042_v63  ;;  %893 = vmatmul.msk.f32.vlgmr.msrb.gmra.mxu0 %vm50_vm0, %v459_v37  ;;  %900 = vmatmul.msk.f32.vlgmr.msrb.gmra.mxu1 %vm50_vm0, %v552_v23  ;;  %v460_v7 = vmax.f32 %v458_v14, -1e+30  ;;  %vm779_vm6 = vcmp.eq.s32.totalorder %v29_v31, 1  ;;  %vm1661_vm8 = vcmp.eq.s32.totalorder %v29_v31, 0 }
 0x13a   :  { %v1044_v42 = vpop.eup %1043  ;;  %v646_v53 = vmax.f32 %v644_v60, -1e+30  ;;  %vm1657_vm7 = vmand %vm778_vm5, %vm779_vm6 }
 0x13b   :  { %v1640_v25 = vadd.f32 %v733_v39, %v1524_v2  ;;  %v547_v18 = vmul.f32 0.6931472, %v1044_v42 }
 0x13c   :  { %908 = vmatmul.msk.f32.gmra.mxu2 %vm50_vm0, %v646_v53 }
 0x13d   :  { %v1646_v54 = vadd.f32 %v547_v18, %v1531_v51  ;;  %v737_v33 = vsub.f32 %v1440_v38, %v1640_v25 }
 0x13f   :  { %v551_v55 = vsub.f32 %v1453_v40, %v1646_v54  ;;  %v739_v16 = vmax.f32 %v737_v33, -1e+30  ;;  %v119_v40 = vsub.f32 -1.0, %v1558_v50  ;;  %v398_v50 = vsub.f32 -1.0, %v1569_v30 }
 0x140   :  { %v585_v39 = vsub.f32 -1.0, %v1646_v54  ;;  %v771_v33 = vsub.f32 -1.0, %v1640_v25 }
 0x141   :  { %894 = vmatmul.msk.f32.gmra.mxu0 %vm50_vm0, %v460_v7  ;;  %v553_v2 = vmax.f32 %v551_v55, -1e+30  ;;  %915 = vmatmul.msk.f32.gmra.mxu3 %vm50_vm0, %v739_v16 }
 0x143   :  { %901 = vmatmul.msk.f32.gmra.mxu1 %vm50_vm0, %v553_v2  ;;  %vm792_vm0 = vcmp.le.s32.totalorder %v1146_v1, 1 }
 0x144   :  { %vm793_vm9 = vmand %vm792_vm0, %vm781_vm2 }
 0x197   :  { %v113_v59 = vpop.f32.mrf.mxu0 }
 0x198   :  { %v121_v15 = vsel %vm1661_vm8, %v119_v40, %v113_v59 }
 0x199   :  { %123 = vst [vmem:[#allocation2] sm:$0xff] %v121_v15 }
 0x19b   :  { %v299_v3 = vpop.f32.mrf.mxu2 }
 0x19c   :  { %v307_v46 = vsel %vm1661_vm8, %v305_v61, %v299_v3 }
 0x19d   :  { %309 = vst [vmem:[#allocation2 + $0x20] sm:$0xff] %v307_v46 }
 0x1a1   :  { %v206_v4 = vpop.f32.mrf.mxu1 }
 0x1a2   :  { %v214_v62 = vsel %vm1661_vm8, %v212_v24, %v206_v4 }
 0x1a3   :  { %216 = vst [vmem:[#allocation2 + $0x10] sm:$0xff] %v214_v62 }
 0x1a4   :  { %v392_v6 = vpop.f32.mrf.mxu3 }
 0x1a5   :  { %v400_v56 = vsel %vm1661_vm8, %v398_v50, %v392_v6 }
 0x1a6   :  { %402 = vst [vmem:[#allocation2 + $0x30] sm:$0xff] %v400_v56 }
 0x1a9   :  { %v116_v44 = vpop.f32.mrf.mxu0 }
 0x1aa   :  { %v122_v9 = vsel %vm1661_vm8, %v120_v41, %v116_v44  ;;  %v785_v37 = vld [vmem:[#allocation2] ss:$16 sm:$0x3] }
 0x1ab   :  { %124 = vst [vmem:[#allocation2 + $0x8] sm:$0xff] %v122_v9 }
 0x1ac   :  { %v302_v10 = vpop.f32.mrf.mxu2  ;;  %v395_v8 = vpop.f32.mrf.mxu3 }
 0x1ad   :  { %v308_v30 = vsel %vm1661_vm8, %v306_v43, %v302_v10  ;;  %v401_v29 = vsel %vm1661_vm8, %v399_v28, %v395_v8  ;;  %v786_v21 = vld [vmem:[#allocation2] ss:$16 sm:$0xc] }
 0x1ae   :  { %310 = vst [vmem:[#allocation2 + $0x28] sm:$0xff] %v308_v30  ;;  %v209_v27 = vpop.f32.mrf.mxu1  ;;  %v787_v42 = vor.u32 %v786_v21, %v785_v37 }
 0x1af   :  { %403 = vst [vmem:[#allocation2 + $0x38] sm:$0xff] %v401_v29  ;;  %v215_v13 = vsel %vm1661_vm8, %v213_v12, %v209_v27 }
 0x1b0   :  { %217 = vst [vmem:[#allocation2 + $0x18] sm:$0xff] %v215_v13 }
 0x1b4   :  { %v671_v57 = vpop.f32.mrf.mxu2 }
 0x1b5   :  { %v679_v52 = vsel %vm1661_vm8, %v677_v11, %v671_v57 }
 0x1b6   :  { %681 = vst [vmem:[#allocation2 + $0x60] sm:$0xff] %v679_v52  ;;  %v485_v47 = vpop.f32.mrf.mxu0  ;;  %v578_v20 = vpop.f32.mrf.mxu1 }
 0x1b7   :  { %v764_v17 = vpop.f32.mrf.mxu3  ;;  %v493_v0 = vsel %vm1661_vm8, %v491_v48, %v485_v47  ;;  %v586_v35 = vsel %vm1661_vm8, %v584_v19, %v578_v20 }
 0x1b8   :  { %v772_v58 = vsel %vm1661_vm8, %v770_v45, %v764_v17  ;;  %495 = vst [vmem:[#allocation2 + $0x40] sm:$0xff] %v493_v0 }
 0x1b9   :  { %774 = vst [vmem:[#allocation2 + $0x70] sm:$0xff] %v772_v58 }
 0x1ba   :  { %588 = vst [vmem:[#allocation2 + $0x50] sm:$0xff] %v586_v35 }
 0x1be   :  { %v488_v23 = vpop.f32.mrf.mxu0 }
 0x1bf   :  { %v674_v63 = vpop.f32.mrf.mxu2  ;;  %v494_v60 = vsel %vm1661_vm8, %v492_v49, %v488_v23 }
 0x1c0   :  { %v680_v53 = vsel %vm1661_vm8, %v678_v5, %v674_v63  ;;  %496 = vst [vmem:[#allocation2 + $0x48] sm:$0xff] %v494_v60  ;;  %v581_v18 = vpop.f32.mrf.mxu1  ;;  %v790_v54 = vld [vmem:[#allocation2] ss:$16 sm:$0xc0] }
 0x1c1   :  { %v788_v14 = vld [vmem:[#allocation2] ss:$16 sm:$0x30]  ;;  %682 = vst [vmem:[#allocation2 + $0x68] sm:$0xff] %v680_v53  ;;  %v587_v34 = vsel %vm1661_vm8, %v585_v39, %v581_v18 }
 0x1c2   :  { %v789_v36 = vor.u32 %v788_v14, %v787_v42  ;;  %589 = vst [vmem:[#allocation2 + $0x58] sm:$0xff] %v587_v34 }
 0x1c3   :  { %859 = sbr.rel (%p918_p9) target bundleno = 617 (0x269), region = 37 }
 0x1c4   :  { %v791_v7 = vor.u32 %v790_v54, %v789_v36  ;;  %v767_v55 = vpop.f32.mrf.mxu3 }
 0x1c5   :  { %v773_v16 = vsel %vm1661_vm8, %v771_v33, %v767_v55 }
 0x1c6   :  { %v794_v2 = vsel %vm793_vm9, %v791_v7, -1e+30   ;;  %775 = vst [vmem:[#allocation2 + $0x78] sm:$0xff] %v773_v16 }
 0x1c7   :  { %v1103_v31 = vmov %v794_v2  }
 0x1c8   :  { %v1095_v40 = vmov %v794_v2  }
 0x1c9 LB: > { %s1109_s7 = smov 1   ;;  %s1110_s8 = smov 2   ;;  %v810_v27 = vstv %s1101_s3  ;;  %s1101_s3 = sphi %s1718_s3, %s798_s3   ;;  %v1097_v40 = vphi %v1095_v40, %v1096_v40  }
 0x1ca   : > { %813 = vrot.lane.b32.xlu0 %v1097_v40, %s1109_s7  ;;  %s802_s13 = scalar_lea.vmem [#allocation2], %s1101_s3  ;;  %vm811_vm10 = vcmp.lt.s32.totalorder %v810_v27, %v1390_v22  ;;  %s798_s3 = sadd.s32 1, %s1101_s3  }
 0x1cb   : > { %vm812_vm11 = vmand %vm781_vm2, %vm811_vm10  ;;  %p797_p10 = scmp.ge.s32.totalorder %s798_s3, %s1456_s5 }
 0x1cd   : > { %v803_v41 = vld [vmem:[%s802_s13] ss:$16 sm:$0x3] }
 0x1ce   : > { %v804_v44 = vld [vmem:[%s802_s13] ss:$16 sm:$0xc] }
 0x1cf   : > { %v805_v10 = vor.u32 %v804_v44, %v803_v41  ;;  %v806_v8 = vld [vmem:[%s802_s13] ss:$16 sm:$0x30] }
 0x1d0   : > { %v808_v29 = vld [vmem:[%s802_s13] ss:$16 sm:$0xc0] }
 0x1d1   : > { %v807_v30 = vor.u32 %v806_v8, %v805_v10 }
 0x1d2   : > { %815 = vrot.lane.b32.xlu0 %v1097_v40, %s1110_s8 }
 0x1d3   : > { %v809_v13 = vor.u32 %v808_v29, %v807_v30 }
 0x23c   : > { %v814_v25 = vpop.permute.xlu0 %813 }
 0x23d   : > { %v818_v38 = vmax.f32 %v1097_v40, %v814_v25 }
 0x244   : > { %v816_v59 = vpop.permute.xlu0 %815 }
 0x245   : > { %v817_v15 = vsel %vm1657_vm7, %v816_v59, -1e+30 }
 0x246   : > { %v819_v61 = vmax.f32 %v818_v38, %v817_v15 }
 0x248   : > { %v820_v3 = vsub.f32 %v1097_v40, %v819_v61  ;;  %v823_v46 = vsub.f32 %v814_v25, %v819_v61  ;;  %v827_v24 = vsub.f32 %v817_v15, %v819_v61 }
 0x24a   : > { %v821_v4 = vmul.f32 1.442695, %v820_v3  ;;  %v824_v62 = vmul.f32 1.442695, %v823_v46  ;;  %v828_v50 = vmul.f32 1.442695, %v827_v24 }
 0x24c   : > { %1045 = vpow2.f32 %v821_v4 }
 0x24d   : > { %1047 = vpow2.f32 %v824_v62 }
 0x24e   : > { %1049 = vpow2.f32 %v828_v50 }
 0x252   : > { %v1046_v6 = vpop.eup %1045 }
 0x253   : > { %v1048_v56 = vpop.eup %1047 }
 0x254   : > { %v826_v9 = vadd.f32 %v1048_v56, %v1046_v6  ;;  %v1050_v43 = vpop.eup %1049 }
 0x256   : > { %v830_v28 = vadd.f32 %v1050_v43, %v826_v9 }
 0x258   : > { %1051 = vlog2.f32 %v830_v28 }
 0x25e   : > { %v1052_v12 = vpop.eup %1051 }
 0x25f   : > { %v832_v11 = vmul.f32 0.6931472, %v1052_v12 }
 0x261   : > { %v833_v57 = vadd.f32 %v832_v11, %v819_v61 }
 0x263   : > { %v834_v52 = vadd.f32 %v833_v57, %v809_v13 }
 0x264   :  { %800 = sbr.rel (!%p797_p10) target bundleno = 457 (0x1c9), region = 43 }
 0x265   : > { %v835_v48 = vmax.f32 %v834_v52, -1e+30 }
 0x267   : > { %v836_v19 = vsel %vm812_vm11, %v835_v48, %v1097_v40  }
 0x268   : > { %v1096_v40 = vmov %v836_v19   ;;  %v1104_v31 = vmov (%p797_p10), %v836_v19  }
 0x269 PF:  { %v837_v45 = vsel %vm1421_vm4, %v1105_v31, -1e+30  ;;  %vm849_vm12 = vcmask 7168   ;;  %v1105_v31 = vphi %v1103_v31, %v1104_v31  }
 0x26a   :  { %838 = vmax.xlane.f32.xlu0 %v837_v45 }
 0x2dd   :  { %v839_v47 = vpop.xlane.xlu0 %838 }
 0x2de   :  { %v840_v20 = vsub.f32 %v837_v45, %v839_v47 }
 0x2e0   :  { %v841_v17 = vmul.f32 1.442695, %v840_v20 }
 0x2e2   :  { %1053 = vpow2.f32 %v841_v17 }
 0x2e8   :  { %v1054_v0 = vpop.eup %1053 }
 0x2e9   :  { %843 = vadd.xlane.f32.xlu0 %v1054_v0 }
 0x35c   :  { %v844_v35 = vpop.xlane.xlu0 %843 }
 0x35d   :  { %1055 = vlog2.f32 %v844_v35 }
 0x363   :  { %v1056_v58 = vpop.eup %1055 }
 0x364   :  { %v846_v21 = vmul.f32 0.6931472, %v1056_v58 }
 0x366   :  { %v847_v49 = vadd.f32 %v846_v21, %v839_v47 }
 0x368   :  { %v848_v1 = vsub.f32 0.0, %v847_v49 }
 0x36a   :  { %850 = vst.msk [vmem:[%s1743_s4] sm:$0xff] %vm849_vm12, %v848_v1 }

</bundles_post_ra>
